<compile_context>
chip_gen: v5e
topology: v5e:2x2
jax: 0.10.0
libtpu: 0.0.40
codegen_flags: <defaults>
</compile_context>

<pallas_src>
import math

import jax
import jax.numpy as jnp
from jax.experimental import pallas as pl
from jax.experimental.pallas import tpu as pltpu

# ----------------------------- model config (small) -------------------------
VOCAB = 128
D_MODEL = 64
NHEAD = 4
NUM_LAYERS = 2
DIM_FF = 128
MAX_LEN = 64
PAD_ID = 3
LN_EPS = 1e-5
NEG_INF = jnp.float32(-1e9)          # finite large-negative mask value

MXU_DTYPE = jnp.bfloat16             # MXU operand dtype (f32 accumulation)
W_DTYPE = jnp.bfloat16               # storage dtype for matmul weights / embedding


# ----------------------------- fused Pallas kernel ---------------------------
def _fused_lm_kernel(ids_ref, pe_ref, mask_ref, emb_ref,
                     in_w_ref, in_b_ref, out_w_ref, out_b_ref,
                     ln1_g_ref, ln1_b_ref, ff1_w_ref, ff1_b_ref,
                     ff2_w_ref, ff2_b_ref, ln2_g_ref, ln2_b_ref,
                     fc_w_ref, fc_b_ref, o_ref):
    S = ids_ref.shape[0]
    D, H = D_MODEL, NHEAD
    Dh = D // H
    scale = 1.0 / math.sqrt(Dh)

    def matmul(a, b):
        # (M, K) @ (K, N) on the MXU, bf16 operands, f32 accumulation.
        return jax.lax.dot_general(
            a.astype(MXU_DTYPE), b.astype(MXU_DTYPE),
            dimension_numbers=(((1,), (0,)), ((), ())),
            preferred_element_type=jnp.float32)

    def qkt(q, k):
        # (S, Dh) x (S, Dh) -> (S, S), contracting the last axis of both
        # (no explicit k.T / XLU transpose).
        return jax.lax.dot_general(
            q.astype(MXU_DTYPE), k.astype(MXU_DTYPE),
            dimension_numbers=(((1,), (1,)), ((), ())),
            preferred_element_type=jnp.float32)

    def layernorm(x, g, b):
        mu = jnp.mean(x, axis=-1, keepdims=True)
        var = jnp.mean(jnp.square(x - mu), axis=-1, keepdims=True)
        return (x - mu) * jax.lax.rsqrt(var + LN_EPS) * g + b

    # --- embedding as a one-hot MXU matmul + scale + positional encoding ----
    ids = ids_ref[...]                                          # (S, 1) int32
    vocab_iota = jax.lax.broadcasted_iota(jnp.int32, (S, VOCAB), 1)
    one_hot = (ids == vocab_iota).astype(jnp.float32)           # (S, VOCAB)
    x = matmul(one_hot, emb_ref[...]) * math.sqrt(D) + pe_ref[...]   # (S, D)

    m = mask_ref[0]                                             # (S, S) additive, finite

    # --- encoder layers (statically unrolled) --------------------------------
    for l in range(NUM_LAYERS):
        qkv = matmul(x, in_w_ref[l]) + in_b_ref[l]              # (S, 3D)

        heads = []
        for h in range(H):                                      # head split via static slices
            q = qkv[:, h * Dh:(h + 1) * Dh]
            k = qkv[:, D + h * Dh:D + (h + 1) * Dh]
            v = qkv[:, 2 * D + h * Dh:2 * D + (h + 1) * Dh]
            s = qkt(q, k) * scale + m                           # (S, S)
            s = s - jnp.max(s, axis=-1, keepdims=True)
            p = jnp.exp(s)
            p = p * pl.reciprocal(jnp.sum(p, axis=-1, keepdims=True), approx=True)
            heads.append(matmul(p, v))                          # (S, Dh)
        attn = jnp.concatenate(heads, axis=-1)                  # (S, D)

        attn = matmul(attn, out_w_ref[l]) + out_b_ref[l]        # (S, D)
        x = layernorm(x + attn, ln1_g_ref[l], ln1_b_ref[l])

        hmid = jnp.maximum(matmul(x, ff1_w_ref[l]) + ff1_b_ref[l], 0.0)   # (S, FF)
        ff = matmul(hmid, ff2_w_ref[l]) + ff2_b_ref[l]                    # (S, D)
        x = layernorm(x + ff, ln2_g_ref[l], ln2_b_ref[l])

    # --- final vocab projection (lane-dense 128-wide output) -----------------
    o_ref[...] = matmul(x, fc_w_ref[...]) + fc_b_ref[...]       # (S, VOCAB)


# ----------------------------- parameter init --------------------------------
def init_params(key):
    ks = iter(jax.random.split(key, 16))

    def w(shape, scale=0.02):
        return (scale * jax.random.normal(next(ks), shape)).astype(W_DTYPE)

    L, D, FF = NUM_LAYERS, D_MODEL, DIM_FF
    return {
        "embedding": w((VOCAB, D)),
        "in_w":  w((L, D, 3 * D)),
        "in_b":  jnp.zeros((L, 1, 3 * D), jnp.float32),
        "out_w": w((L, D, D)),
        "out_b": jnp.zeros((L, 1, D), jnp.float32),
        "ln1_g": jnp.ones((L, 1, D), jnp.float32),
        "ln1_b": jnp.zeros((L, 1, D), jnp.float32),
        "ff1_w": w((L, D, FF)),
        "ff1_b": jnp.zeros((L, 1, FF), jnp.float32),
        "ff2_w": w((L, FF, D)),
        "ff2_b": jnp.zeros((L, 1, D), jnp.float32),
        "ln2_g": jnp.ones((L, 1, D), jnp.float32),
        "ln2_b": jnp.zeros((L, 1, D), jnp.float32),
        "fc_out_w": w((D, VOCAB)),
        "fc_out_b": jnp.zeros((1, VOCAB), jnp.float32),
    }


def positional_encoding(max_len, d_model):
    position = jnp.arange(max_len, dtype=jnp.float32)[:, None]
    div_term = jnp.exp(jnp.arange(0, d_model, 2, dtype=jnp.float32)
                       * (-math.log(10000.0) / d_model))
    pe = jnp.zeros((max_len, d_model), jnp.float32)
    pe = pe.at[:, 0::2].set(jnp.sin(position * div_term))
    pe = pe.at[:, 1::2].set(jnp.cos(position * div_term))
    return pe


# ----------------------------- forward pass -----------------------------------
def transformer_lm_forward(input_ids, params):
    B, S = input_ids.shape
    D = D_MODEL

    ids_2d = input_ids.reshape(B * S, 1).astype(jnp.int32)
    pe_bs = jnp.tile(positional_encoding(MAX_LEN, D)[:S], (B, 1))        # (B*S, D)

    # Causal mask + key-padding mask (input_ids == 3), finite large-negative.
    causal = jnp.where(jnp.triu(jnp.ones((S, S), jnp.bool_), 1), NEG_INF, 0.0)
    pad = input_ids == PAD_ID                                            # (B, S)
    mask = causal[None, :, :] + jnp.where(pad[:, None, :], NEG_INF, 0.0)  # (B, S, S)

    args = (ids_2d, pe_bs, mask, params["embedding"],
            params["in_w"], params["in_b"], params["out_w"], params["out_b"],
            params["ln1_g"], params["ln1_b"], params["ff1_w"], params["ff1_b"],
            params["ff2_w"], params["ff2_b"], params["ln2_g"], params["ln2_b"],
            params["fc_out_w"], params["fc_out_b"])

    def _full_spec(arr):
        zeros = (0,) * arr.ndim
        return pl.BlockSpec(arr.shape, lambda b, _z=zeros: _z)

    in_specs = [
        pl.BlockSpec((S, 1), lambda b: (b, 0)),          # ids
        pl.BlockSpec((S, D), lambda b: (b, 0)),          # positional encoding
        pl.BlockSpec((1, S, S), lambda b: (b, 0, 0)),    # additive mask
    ] + [_full_spec(a) for a in args[3:]]                # table + all weights (resident)

    flops_per_batch = (
        2 * S * VOCAB * D
        + NUM_LAYERS * (
            2 * S * D * 3 * D                            # QKV projection
            + NHEAD * (4 * S * S * (D // NHEAD))         # scores + p@v
            + 2 * S * D * D                              # out projection
            + 4 * S * D * DIM_FF                         # FFN
        )
        + 2 * S * D * VOCAB                              # fc_out
    )
    bytes_accessed = sum(int(a.size) * a.dtype.itemsize for a in args) \
        + B * S * VOCAB * 4
    cost = pl.CostEstimate(
        flops=B * flops_per_batch,
        transcendentals=B * NUM_LAYERS * NHEAD * S * S,
        bytes_accessed=bytes_accessed,
    )

    logits = pl.pallas_call(
        _fused_lm_kernel,
        out_shape=jax.ShapeDtypeStruct((B * S, VOCAB), jnp.float32),
        grid=(B,),
        in_specs=in_specs,
        out_specs=pl.BlockSpec((S, VOCAB), lambda b: (b, 0)),
        compiler_params=pltpu.CompilerParams(dimension_semantics=("parallel",)),
        cost_estimate=cost,
    )(*args)

    return logits.reshape(B, S, VOCAB)


# ----------------------------- main -------------------------------------------
if __name__ == "__main__":
    key = jax.random.PRNGKey(0)
    pkey, ikey = jax.random.split(key)
    params = init_params(pkey)

    B, S = 2, 8
    # deterministic token ids in [4, VOCAB); PAD tokens would also be safe
    # now that the mask is finite (-1e9) rather than -inf.
    input_ids = jax.random.randint(ikey, (B, S), 4, VOCAB, dtype=jnp.int32)

    fwd = jax.jit(transformer_lm_forward)
    logits = fwd(input_ids, params)
    logits = jax.block_until_ready(logits)

    assert logits.shape == (B, S, VOCAB)
    assert logits.dtype == jnp.float32
    assert bool(jnp.all(jnp.isfinite(logits)))
    print("KERNEL_OK")
</pallas_src>

<mosaic_0001>
module attributes {stable_mosaic.version = 11 : i64} {
  func.func @_fused_lm_kernel(%arg0: i32, %arg1: memref<8x1xi32, #tpu.memory_space<vmem>>, %arg2: memref<8x64xf32, #tpu.memory_space<vmem>>, %arg3: memref<1x8x8xf32, #tpu.memory_space<vmem>>, %arg4: memref<128x64xbf16, #tpu.memory_space<vmem>>, %arg5: memref<2x64x192xbf16, #tpu.memory_space<vmem>>, %arg6: memref<2x1x192xf32, #tpu.memory_space<vmem>>, %arg7: memref<2x64x64xbf16, #tpu.memory_space<vmem>>, %arg8: memref<2x1x64xf32, #tpu.memory_space<vmem>>, %arg9: memref<2x1x64xf32, #tpu.memory_space<vmem>>, %arg10: memref<2x1x64xf32, #tpu.memory_space<vmem>>, %arg11: memref<2x64x128xbf16, #tpu.memory_space<vmem>>, %arg12: memref<2x1x128xf32, #tpu.memory_space<vmem>>, %arg13: memref<2x128x64xbf16, #tpu.memory_space<vmem>>, %arg14: memref<2x1x64xf32, #tpu.memory_space<vmem>>, %arg15: memref<2x1x64xf32, #tpu.memory_space<vmem>>, %arg16: memref<2x1x64xf32, #tpu.memory_space<vmem>>, %arg17: memref<64x128xbf16, #tpu.memory_space<vmem>>, %arg18: memref<1x128xf32, #tpu.memory_space<vmem>>, %arg19: memref<8x128xf32, #tpu.memory_space<vmem>>) attributes {dimension_semantics = [#tpu.dimension_semantics<parallel>], iteration_bounds = array<i64: 2>, scalar_prefetch = 0 : i64, scratch_operands = 0 : i64, tpu.core_type = #tpu.core_type<tc>, window_params = [{transform_indices = @transform_0, window_bounds = array<i64: 8, 1>}, {transform_indices = @transform_1, window_bounds = array<i64: 8, 64>}, {transform_indices = @transform_2, window_bounds = array<i64: 1, 8, 8>}, {pipeline_mode = #tpu.pipeline_mode<synchronous>, transform_indices = @transform_3, window_bounds = array<i64: 128, 64>}, {pipeline_mode = #tpu.pipeline_mode<synchronous>, transform_indices = @transform_4, window_bounds = array<i64: 2, 64, 192>}, {pipeline_mode = #tpu.pipeline_mode<synchronous>, transform_indices = @transform_5, window_bounds = array<i64: 2, 1, 192>}, {pipeline_mode = #tpu.pipeline_mode<synchronous>, transform_indices = @transform_6, window_bounds = array<i64: 2, 64, 64>}, {pipeline_mode = #tpu.pipeline_mode<synchronous>, transform_indices = @transform_7, window_bounds = array<i64: 2, 1, 64>}, {pipeline_mode = #tpu.pipeline_mode<synchronous>, transform_indices = @transform_8, window_bounds = array<i64: 2, 1, 64>}, {pipeline_mode = #tpu.pipeline_mode<synchronous>, transform_indices = @transform_9, window_bounds = array<i64: 2, 1, 64>}, {pipeline_mode = #tpu.pipeline_mode<synchronous>, transform_indices = @transform_10, window_bounds = array<i64: 2, 64, 128>}, {pipeline_mode = #tpu.pipeline_mode<synchronous>, transform_indices = @transform_11, window_bounds = array<i64: 2, 1, 128>}, {pipeline_mode = #tpu.pipeline_mode<synchronous>, transform_indices = @transform_12, window_bounds = array<i64: 2, 128, 64>}, {pipeline_mode = #tpu.pipeline_mode<synchronous>, transform_indices = @transform_13, window_bounds = array<i64: 2, 1, 64>}, {pipeline_mode = #tpu.pipeline_mode<synchronous>, transform_indices = @transform_14, window_bounds = array<i64: 2, 1, 64>}, {pipeline_mode = #tpu.pipeline_mode<synchronous>, transform_indices = @transform_15, window_bounds = array<i64: 2, 1, 64>}, {pipeline_mode = #tpu.pipeline_mode<synchronous>, transform_indices = @transform_16, window_bounds = array<i64: 64, 128>}, {pipeline_mode = #tpu.pipeline_mode<synchronous>, transform_indices = @transform_17, window_bounds = array<i64: 1, 128>}, {transform_indices = @transform_18, window_bounds = array<i64: 8, 128>}]} {
    %c0 = arith.constant 0 : index
    %c0_0 = arith.constant 0 : index
    %0 = vector.load %arg1[%c0, %c0_0] : memref<8x1xi32, #tpu.memory_space<vmem>>, vector<8x1xi32>
    %1 = tpu.iota {dimensions = array<i32: 1>} : vector<8x128xi32>
    %2 = vector.broadcast %0 : vector<8x1xi32> to vector<8x128xi32>
    %3 = arith.cmpi eq, %2, %1 : vector<8x128xi32>
    %4 = arith.extui %3 : vector<8x128xi1> to vector<8x128xi32>
    %5 = arith.sitofp %4 : vector<8x128xi32> to vector<8x128xf32>
    %c0_1 = arith.constant 0 : index
    %c0_2 = arith.constant 0 : index
    %6 = vector.load %arg4[%c0_1, %c0_2] : memref<128x64xbf16, #tpu.memory_space<vmem>>, vector<128x64xbf16>
    %7 = arith.truncf %5 : vector<8x128xf32> to vector<8x128xbf16>
    %cst = arith.constant dense<0.000000e+00> : vector<8x64xf32>
    %8 = tpu.matmul %7, %6, %cst {dimension_numbers = #tpu.dot_dimension_numbers<[1], [0], [0], [1], [0, 0, 1, 1], [], []>} : vector<8x128xbf16>, vector<128x64xbf16>, vector<8x64xf32> -> vector<8x64xf32>
    %cst_3 = arith.constant 8.000000e+00 : f32
    %9 = vector.broadcast %cst_3 : f32 to vector<8x64xf32>
    %10 = arith.mulf %8, %9 : vector<8x64xf32>
    %c0_4 = arith.constant 0 : index
    %c0_5 = arith.constant 0 : index
    %11 = vector.load %arg2[%c0_4, %c0_5] : memref<8x64xf32, #tpu.memory_space<vmem>>, vector<8x64xf32>
    %12 = arith.addf %10, %11 : vector<8x64xf32>
    %c0_6 = arith.constant 0 : index
    %c0_7 = arith.constant 0 : index
    %c0_8 = arith.constant 0 : index
    %13 = vector.load %arg3[%c0_6, %c0_7, %c0_8] : memref<1x8x8xf32, #tpu.memory_space<vmem>>, vector<1x8x8xf32>
    %14 = vector.shape_cast %13 : vector<1x8x8xf32> to vector<8x8xf32>
    %c0_9 = arith.constant 0 : index
    %c0_10 = arith.constant 0 : index
    %c0_11 = arith.constant 0 : index
    %15 = vector.load %arg5[%c0_9, %c0_10, %c0_11] : memref<2x64x192xbf16, #tpu.memory_space<vmem>>, vector<1x64x192xbf16>
    %16 = vector.shape_cast %15 : vector<1x64x192xbf16> to vector<64x192xbf16>
    %17 = arith.truncf %12 : vector<8x64xf32> to vector<8x64xbf16>
    %cst_12 = arith.constant dense<0.000000e+00> : vector<8x192xf32>
    %18 = tpu.matmul %17, %16, %cst_12 {dimension_numbers = #tpu.dot_dimension_numbers<[1], [0], [0], [1], [0, 0, 1, 1], [], []>} : vector<8x64xbf16>, vector<64x192xbf16>, vector<8x192xf32> -> vector<8x192xf32>
    %c0_13 = arith.constant 0 : index
    %c0_14 = arith.constant 0 : index
    %c0_15 = arith.constant 0 : index
    %19 = vector.load %arg6[%c0_13, %c0_14, %c0_15] : memref<2x1x192xf32, #tpu.memory_space<vmem>>, vector<1x1x192xf32>
    %20 = vector.shape_cast %19 : vector<1x1x192xf32> to vector<1x192xf32>
    %21 = vector.broadcast %20 : vector<1x192xf32> to vector<8x192xf32>
    %22 = arith.addf %18, %21 : vector<8x192xf32>
    %23 = vector.extract_strided_slice %22 {offsets = [0, 0], sizes = [8, 16], strides = [1, 1]} : vector<8x192xf32> to vector<8x16xf32>
    %24 = vector.extract_strided_slice %22 {offsets = [0, 64], sizes = [8, 16], strides = [1, 1]} : vector<8x192xf32> to vector<8x16xf32>
    %25 = vector.extract_strided_slice %22 {offsets = [0, 128], sizes = [8, 16], strides = [1, 1]} : vector<8x192xf32> to vector<8x16xf32>
    %26 = arith.truncf %23 : vector<8x16xf32> to vector<8x16xbf16>
    %27 = arith.truncf %24 : vector<8x16xf32> to vector<8x16xbf16>
    %cst_16 = arith.constant dense<0.000000e+00> : vector<8x8xf32>
    %28 = tpu.matmul %26, %27, %cst_16 {dimension_numbers = #tpu.dot_dimension_numbers<[1], [1], [0], [0], [0, 0, 1, 0], [], []>} : vector<8x16xbf16>, vector<8x16xbf16>, vector<8x8xf32> -> vector<8x8xf32>
    %cst_17 = arith.constant 2.500000e-01 : f32
    %29 = vector.broadcast %cst_17 : f32 to vector<8x8xf32>
    %30 = arith.mulf %28, %29 : vector<8x8xf32>
    %31 = arith.addf %30, %14 : vector<8x8xf32>
    %cst_18 = arith.constant dense<0xFF800000> : vector<8xf32>
    %32 = vector.multi_reduction <maximumf>, %31, %cst_18 [1] : vector<8x8xf32> to vector<8xf32>
    %33 = vector.shape_cast %32 : vector<8xf32> to vector<8x1xf32>
    %34 = vector.broadcast %33 : vector<8x1xf32> to vector<8x8xf32>
    %35 = arith.subf %31, %34 : vector<8x8xf32>
    %36 = math.exp %35 : vector<8x8xf32>
    %cst_19 = arith.constant dense<0.000000e+00> : vector<8xf32>
    %37 = vector.multi_reduction <add>, %36, %cst_19 [1] : vector<8x8xf32> to vector<8xf32>
    %38 = vector.shape_cast %37 : vector<8xf32> to vector<8x1xf32>
    %39 = tpu.reciprocal %38 {approx = true} : vector<8x1xf32> -> vector<8x1xf32>
    %40 = vector.broadcast %39 : vector<8x1xf32> to vector<8x8xf32>
    %41 = arith.mulf %36, %40 : vector<8x8xf32>
    %42 = arith.truncf %41 : vector<8x8xf32> to vector<8x8xbf16>
    %43 = arith.truncf %25 : vector<8x16xf32> to vector<8x16xbf16>
    %cst_20 = arith.constant dense<0.000000e+00> : vector<8x16xf32>
    %44 = tpu.matmul %42, %43, %cst_20 {dimension_numbers = #tpu.dot_dimension_numbers<[1], [0], [0], [1], [0, 0, 1, 1], [], []>} : vector<8x8xbf16>, vector<8x16xbf16>, vector<8x16xf32> -> vector<8x16xf32>
    %45 = vector.extract_strided_slice %22 {offsets = [0, 16], sizes = [8, 16], strides = [1, 1]} : vector<8x192xf32> to vector<8x16xf32>
    %46 = vector.extract_strided_slice %22 {offsets = [0, 80], sizes = [8, 16], strides = [1, 1]} : vector<8x192xf32> to vector<8x16xf32>
    %47 = vector.extract_strided_slice %22 {offsets = [0, 144], sizes = [8, 16], strides = [1, 1]} : vector<8x192xf32> to vector<8x16xf32>
    %48 = arith.truncf %45 : vector<8x16xf32> to vector<8x16xbf16>
    %49 = arith.truncf %46 : vector<8x16xf32> to vector<8x16xbf16>
    %cst_21 = arith.constant dense<0.000000e+00> : vector<8x8xf32>
    %50 = tpu.matmul %48, %49, %cst_21 {dimension_numbers = #tpu.dot_dimension_numbers<[1], [1], [0], [0], [0, 0, 1, 0], [], []>} : vector<8x16xbf16>, vector<8x16xbf16>, vector<8x8xf32> -> vector<8x8xf32>
    %cst_22 = arith.constant 2.500000e-01 : f32
    %51 = vector.broadcast %cst_22 : f32 to vector<8x8xf32>
    %52 = arith.mulf %50, %51 : vector<8x8xf32>
    %53 = arith.addf %52, %14 : vector<8x8xf32>
    %cst_23 = arith.constant dense<0xFF800000> : vector<8xf32>
    %54 = vector.multi_reduction <maximumf>, %53, %cst_23 [1] : vector<8x8xf32> to vector<8xf32>
    %55 = vector.shape_cast %54 : vector<8xf32> to vector<8x1xf32>
    %56 = vector.broadcast %55 : vector<8x1xf32> to vector<8x8xf32>
    %57 = arith.subf %53, %56 : vector<8x8xf32>
    %58 = math.exp %57 : vector<8x8xf32>
    %cst_24 = arith.constant dense<0.000000e+00> : vector<8xf32>
    %59 = vector.multi_reduction <add>, %58, %cst_24 [1] : vector<8x8xf32> to vector<8xf32>
    %60 = vector.shape_cast %59 : vector<8xf32> to vector<8x1xf32>
    %61 = tpu.reciprocal %60 {approx = true} : vector<8x1xf32> -> vector<8x1xf32>
    %62 = vector.broadcast %61 : vector<8x1xf32> to vector<8x8xf32>
    %63 = arith.mulf %58, %62 : vector<8x8xf32>
    %64 = arith.truncf %63 : vector<8x8xf32> to vector<8x8xbf16>
    %65 = arith.truncf %47 : vector<8x16xf32> to vector<8x16xbf16>
    %cst_25 = arith.constant dense<0.000000e+00> : vector<8x16xf32>
    %66 = tpu.matmul %64, %65, %cst_25 {dimension_numbers = #tpu.dot_dimension_numbers<[1], [0], [0], [1], [0, 0, 1, 1], [], []>} : vector<8x8xbf16>, vector<8x16xbf16>, vector<8x16xf32> -> vector<8x16xf32>
    %67 = vector.extract_strided_slice %22 {offsets = [0, 32], sizes = [8, 16], strides = [1, 1]} : vector<8x192xf32> to vector<8x16xf32>
    %68 = vector.extract_strided_slice %22 {offsets = [0, 96], sizes = [8, 16], strides = [1, 1]} : vector<8x192xf32> to vector<8x16xf32>
    %69 = vector.extract_strided_slice %22 {offsets = [0, 160], sizes = [8, 16], strides = [1, 1]} : vector<8x192xf32> to vector<8x16xf32>
    %70 = arith.truncf %67 : vector<8x16xf32> to vector<8x16xbf16>
    %71 = arith.truncf %68 : vector<8x16xf32> to vector<8x16xbf16>
    %cst_26 = arith.constant dense<0.000000e+00> : vector<8x8xf32>
    %72 = tpu.matmul %70, %71, %cst_26 {dimension_numbers = #tpu.dot_dimension_numbers<[1], [1], [0], [0], [0, 0, 1, 0], [], []>} : vector<8x16xbf16>, vector<8x16xbf16>, vector<8x8xf32> -> vector<8x8xf32>
    %cst_27 = arith.constant 2.500000e-01 : f32
    %73 = vector.broadcast %cst_27 : f32 to vector<8x8xf32>
    %74 = arith.mulf %72, %73 : vector<8x8xf32>
    %75 = arith.addf %74, %14 : vector<8x8xf32>
    %cst_28 = arith.constant dense<0xFF800000> : vector<8xf32>
    %76 = vector.multi_reduction <maximumf>, %75, %cst_28 [1] : vector<8x8xf32> to vector<8xf32>
    %77 = vector.shape_cast %76 : vector<8xf32> to vector<8x1xf32>
    %78 = vector.broadcast %77 : vector<8x1xf32> to vector<8x8xf32>
    %79 = arith.subf %75, %78 : vector<8x8xf32>
    %80 = math.exp %79 : vector<8x8xf32>
    %cst_29 = arith.constant dense<0.000000e+00> : vector<8xf32>
    %81 = vector.multi_reduction <add>, %80, %cst_29 [1] : vector<8x8xf32> to vector<8xf32>
    %82 = vector.shape_cast %81 : vector<8xf32> to vector<8x1xf32>
    %83 = tpu.reciprocal %82 {approx = true} : vector<8x1xf32> -> vector<8x1xf32>
    %84 = vector.broadcast %83 : vector<8x1xf32> to vector<8x8xf32>
    %85 = arith.mulf %80, %84 : vector<8x8xf32>
    %86 = arith.truncf %85 : vector<8x8xf32> to vector<8x8xbf16>
    %87 = arith.truncf %69 : vector<8x16xf32> to vector<8x16xbf16>
    %cst_30 = arith.constant dense<0.000000e+00> : vector<8x16xf32>
    %88 = tpu.matmul %86, %87, %cst_30 {dimension_numbers = #tpu.dot_dimension_numbers<[1], [0], [0], [1], [0, 0, 1, 1], [], []>} : vector<8x8xbf16>, vector<8x16xbf16>, vector<8x16xf32> -> vector<8x16xf32>
    %89 = vector.extract_strided_slice %22 {offsets = [0, 48], sizes = [8, 16], strides = [1, 1]} : vector<8x192xf32> to vector<8x16xf32>
    %90 = vector.extract_strided_slice %22 {offsets = [0, 112], sizes = [8, 16], strides = [1, 1]} : vector<8x192xf32> to vector<8x16xf32>
    %91 = vector.extract_strided_slice %22 {offsets = [0, 176], sizes = [8, 16], strides = [1, 1]} : vector<8x192xf32> to vector<8x16xf32>
    %92 = arith.truncf %89 : vector<8x16xf32> to vector<8x16xbf16>
    %93 = arith.truncf %90 : vector<8x16xf32> to vector<8x16xbf16>
    %cst_31 = arith.constant dense<0.000000e+00> : vector<8x8xf32>
    %94 = tpu.matmul %92, %93, %cst_31 {dimension_numbers = #tpu.dot_dimension_numbers<[1], [1], [0], [0], [0, 0, 1, 0], [], []>} : vector<8x16xbf16>, vector<8x16xbf16>, vector<8x8xf32> -> vector<8x8xf32>
    %cst_32 = arith.constant 2.500000e-01 : f32
    %95 = vector.broadcast %cst_32 : f32 to vector<8x8xf32>
    %96 = arith.mulf %94, %95 : vector<8x8xf32>
    %97 = arith.addf %96, %14 : vector<8x8xf32>
    %cst_33 = arith.constant dense<0xFF800000> : vector<8xf32>
    %98 = vector.multi_reduction <maximumf>, %97, %cst_33 [1] : vector<8x8xf32> to vector<8xf32>
    %99 = vector.shape_cast %98 : vector<8xf32> to vector<8x1xf32>
    %100 = vector.broadcast %99 : vector<8x1xf32> to vector<8x8xf32>
    %101 = arith.subf %97, %100 : vector<8x8xf32>
    %102 = math.exp %101 : vector<8x8xf32>
    %cst_34 = arith.constant dense<0.000000e+00> : vector<8xf32>
    %103 = vector.multi_reduction <add>, %102, %cst_34 [1] : vector<8x8xf32> to vector<8xf32>
    %104 = vector.shape_cast %103 : vector<8xf32> to vector<8x1xf32>
    %105 = tpu.reciprocal %104 {approx = true} : vector<8x1xf32> -> vector<8x1xf32>
    %106 = vector.broadcast %105 : vector<8x1xf32> to vector<8x8xf32>
    %107 = arith.mulf %102, %106 : vector<8x8xf32>
    %108 = arith.truncf %107 : vector<8x8xf32> to vector<8x8xbf16>
    %109 = arith.truncf %91 : vector<8x16xf32> to vector<8x16xbf16>
    %cst_35 = arith.constant dense<0.000000e+00> : vector<8x16xf32>
    %110 = tpu.matmul %108, %109, %cst_35 {dimension_numbers = #tpu.dot_dimension_numbers<[1], [0], [0], [1], [0, 0, 1, 1], [], []>} : vector<8x8xbf16>, vector<8x16xbf16>, vector<8x16xf32> -> vector<8x16xf32>
    %111 = tpu.concatenate %44, %66, %88, %110 in 1 : vector<8x16xf32>, vector<8x16xf32>, vector<8x16xf32>, vector<8x16xf32> -> vector<8x64xf32>
    %c0_36 = arith.constant 0 : index
    %c0_37 = arith.constant 0 : index
    %c0_38 = arith.constant 0 : index
    %112 = vector.load %arg7[%c0_36, %c0_37, %c0_38] : memref<2x64x64xbf16, #tpu.memory_space<vmem>>, vector<1x64x64xbf16>
    %113 = vector.shape_cast %112 : vector<1x64x64xbf16> to vector<64x64xbf16>
    %114 = arith.truncf %111 : vector<8x64xf32> to vector<8x64xbf16>
    %cst_39 = arith.constant dense<0.000000e+00> : vector<8x64xf32>
    %115 = tpu.matmul %114, %113, %cst_39 {dimension_numbers = #tpu.dot_dimension_numbers<[1], [0], [0], [1], [0, 0, 1, 1], [], []>} : vector<8x64xbf16>, vector<64x64xbf16>, vector<8x64xf32> -> vector<8x64xf32>
    %c0_40 = arith.constant 0 : index
    %c0_41 = arith.constant 0 : index
    %c0_42 = arith.constant 0 : index
    %116 = vector.load %arg8[%c0_40, %c0_41, %c0_42] : memref<2x1x64xf32, #tpu.memory_space<vmem>>, vector<1x1x64xf32>
    %117 = vector.shape_cast %116 : vector<1x1x64xf32> to vector<1x64xf32>
    %118 = vector.broadcast %117 : vector<1x64xf32> to vector<8x64xf32>
    %119 = arith.addf %115, %118 : vector<8x64xf32>
    %120 = arith.addf %12, %119 : vector<8x64xf32>
    %c0_43 = arith.constant 0 : index
    %c0_44 = arith.constant 0 : index
    %c0_45 = arith.constant 0 : index
    %121 = vector.load %arg9[%c0_43, %c0_44, %c0_45] : memref<2x1x64xf32, #tpu.memory_space<vmem>>, vector<1x1x64xf32>
    %122 = vector.shape_cast %121 : vector<1x1x64xf32> to vector<1x64xf32>
    %c0_46 = arith.constant 0 : index
    %c0_47 = arith.constant 0 : index
    %c0_48 = arith.constant 0 : index
    %123 = vector.load %arg10[%c0_46, %c0_47, %c0_48] : memref<2x1x64xf32, #tpu.memory_space<vmem>>, vector<1x1x64xf32>
    %124 = vector.shape_cast %123 : vector<1x1x64xf32> to vector<1x64xf32>
    %cst_49 = arith.constant dense<0.000000e+00> : vector<8xf32>
    %125 = vector.multi_reduction <add>, %120, %cst_49 [1] : vector<8x64xf32> to vector<8xf32>
    %126 = vector.shape_cast %125 : vector<8xf32> to vector<8x1xf32>
    %cst_50 = arith.constant 6.400000e+01 : f32
    %127 = vector.broadcast %cst_50 : f32 to vector<8x1xf32>
    %128 = arith.divf %126, %127 : vector<8x1xf32>
    %129 = vector.broadcast %128 : vector<8x1xf32> to vector<8x64xf32>
    %130 = arith.subf %120, %129 : vector<8x64xf32>
    %131 = arith.mulf %130, %130 : vector<8x64xf32>
    %cst_51 = arith.constant dense<0.000000e+00> : vector<8xf32>
    %132 = vector.multi_reduction <add>, %131, %cst_51 [1] : vector<8x64xf32> to vector<8xf32>
    %133 = vector.shape_cast %132 : vector<8xf32> to vector<8x1xf32>
    %cst_52 = arith.constant 6.400000e+01 : f32
    %134 = vector.broadcast %cst_52 : f32 to vector<8x1xf32>
    %135 = arith.divf %133, %134 : vector<8x1xf32>
    %136 = vector.broadcast %128 : vector<8x1xf32> to vector<8x64xf32>
    %137 = arith.subf %120, %136 : vector<8x64xf32>
    %cst_53 = arith.constant 9.99999974E-6 : f32
    %138 = vector.broadcast %cst_53 : f32 to vector<8x1xf32>
    %139 = arith.addf %135, %138 : vector<8x1xf32>
    %140 = math.rsqrt %139 : vector<8x1xf32>
    %141 = vector.broadcast %140 : vector<8x1xf32> to vector<8x64xf32>
    %142 = arith.mulf %137, %141 : vector<8x64xf32>
    %143 = vector.broadcast %122 : vector<1x64xf32> to vector<8x64xf32>
    %144 = arith.mulf %142, %143 : vector<8x64xf32>
    %145 = vector.broadcast %124 : vector<1x64xf32> to vector<8x64xf32>
    %146 = arith.addf %144, %145 : vector<8x64xf32>
    %c0_54 = arith.constant 0 : index
    %c0_55 = arith.constant 0 : index
    %c0_56 = arith.constant 0 : index
    %147 = vector.load %arg11[%c0_54, %c0_55, %c0_56] : memref<2x64x128xbf16, #tpu.memory_space<vmem>>, vector<1x64x128xbf16>
    %148 = vector.shape_cast %147 : vector<1x64x128xbf16> to vector<64x128xbf16>
    %149 = arith.truncf %146 : vector<8x64xf32> to vector<8x64xbf16>
    %cst_57 = arith.constant dense<0.000000e+00> : vector<8x128xf32>
    %150 = tpu.matmul %149, %148, %cst_57 {dimension_numbers = #tpu.dot_dimension_numbers<[1], [0], [0], [1], [0, 0, 1, 1], [], []>} : vector<8x64xbf16>, vector<64x128xbf16>, vector<8x128xf32> -> vector<8x128xf32>
    %c0_58 = arith.constant 0 : index
    %c0_59 = arith.constant 0 : index
    %c0_60 = arith.constant 0 : index
    %151 = vector.load %arg12[%c0_58, %c0_59, %c0_60] : memref<2x1x128xf32, #tpu.memory_space<vmem>>, vector<1x1x128xf32>
    %152 = vector.shape_cast %151 : vector<1x1x128xf32> to vector<1x128xf32>
    %153 = vector.broadcast %152 : vector<1x128xf32> to vector<8x128xf32>
    %154 = arith.addf %150, %153 : vector<8x128xf32>
    %cst_61 = arith.constant 0.000000e+00 : f32
    %155 = vector.broadcast %cst_61 : f32 to vector<8x128xf32>
    %156 = arith.maximumf %154, %155 : vector<8x128xf32>
    %c0_62 = arith.constant 0 : index
    %c0_63 = arith.constant 0 : index
    %c0_64 = arith.constant 0 : index
    %157 = vector.load %arg13[%c0_62, %c0_63, %c0_64] : memref<2x128x64xbf16, #tpu.memory_space<vmem>>, vector<1x128x64xbf16>
    %158 = vector.shape_cast %157 : vector<1x128x64xbf16> to vector<128x64xbf16>
    %159 = arith.truncf %156 : vector<8x128xf32> to vector<8x128xbf16>
    %cst_65 = arith.constant dense<0.000000e+00> : vector<8x64xf32>
    %160 = tpu.matmul %159, %158, %cst_65 {dimension_numbers = #tpu.dot_dimension_numbers<[1], [0], [0], [1], [0, 0, 1, 1], [], []>} : vector<8x128xbf16>, vector<128x64xbf16>, vector<8x64xf32> -> vector<8x64xf32>
    %c0_66 = arith.constant 0 : index
    %c0_67 = arith.constant 0 : index
    %c0_68 = arith.constant 0 : index
    %161 = vector.load %arg14[%c0_66, %c0_67, %c0_68] : memref<2x1x64xf32, #tpu.memory_space<vmem>>, vector<1x1x64xf32>
    %162 = vector.shape_cast %161 : vector<1x1x64xf32> to vector<1x64xf32>
    %163 = vector.broadcast %162 : vector<1x64xf32> to vector<8x64xf32>
    %164 = arith.addf %160, %163 : vector<8x64xf32>
    %165 = arith.addf %146, %164 : vector<8x64xf32>
    %c0_69 = arith.constant 0 : index
    %c0_70 = arith.constant 0 : index
    %c0_71 = arith.constant 0 : index
    %166 = vector.load %arg15[%c0_69, %c0_70, %c0_71] : memref<2x1x64xf32, #tpu.memory_space<vmem>>, vector<1x1x64xf32>
    %167 = vector.shape_cast %166 : vector<1x1x64xf32> to vector<1x64xf32>
    %c0_72 = arith.constant 0 : index
    %c0_73 = arith.constant 0 : index
    %c0_74 = arith.constant 0 : index
    %168 = vector.load %arg16[%c0_72, %c0_73, %c0_74] : memref<2x1x64xf32, #tpu.memory_space<vmem>>, vector<1x1x64xf32>
    %169 = vector.shape_cast %168 : vector<1x1x64xf32> to vector<1x64xf32>
    %cst_75 = arith.constant dense<0.000000e+00> : vector<8xf32>
    %170 = vector.multi_reduction <add>, %165, %cst_75 [1] : vector<8x64xf32> to vector<8xf32>
    %171 = vector.shape_cast %170 : vector<8xf32> to vector<8x1xf32>
    %cst_76 = arith.constant 6.400000e+01 : f32
    %172 = vector.broadcast %cst_76 : f32 to vector<8x1xf32>
    %173 = arith.divf %171, %172 : vector<8x1xf32>
    %174 = vector.broadcast %173 : vector<8x1xf32> to vector<8x64xf32>
    %175 = arith.subf %165, %174 : vector<8x64xf32>
    %176 = arith.mulf %175, %175 : vector<8x64xf32>
    %cst_77 = arith.constant dense<0.000000e+00> : vector<8xf32>
    %177 = vector.multi_reduction <add>, %176, %cst_77 [1] : vector<8x64xf32> to vector<8xf32>
    %178 = vector.shape_cast %177 : vector<8xf32> to vector<8x1xf32>
    %cst_78 = arith.constant 6.400000e+01 : f32
    %179 = vector.broadcast %cst_78 : f32 to vector<8x1xf32>
    %180 = arith.divf %178, %179 : vector<8x1xf32>
    %181 = vector.broadcast %173 : vector<8x1xf32> to vector<8x64xf32>
    %182 = arith.subf %165, %181 : vector<8x64xf32>
    %cst_79 = arith.constant 9.99999974E-6 : f32
    %183 = vector.broadcast %cst_79 : f32 to vector<8x1xf32>
    %184 = arith.addf %180, %183 : vector<8x1xf32>
    %185 = math.rsqrt %184 : vector<8x1xf32>
    %186 = vector.broadcast %185 : vector<8x1xf32> to vector<8x64xf32>
    %187 = arith.mulf %182, %186 : vector<8x64xf32>
    %188 = vector.broadcast %167 : vector<1x64xf32> to vector<8x64xf32>
    %189 = arith.mulf %187, %188 : vector<8x64xf32>
    %190 = vector.broadcast %169 : vector<1x64xf32> to vector<8x64xf32>
    %191 = arith.addf %189, %190 : vector<8x64xf32>
    %c1 = arith.constant 1 : index
    %c0_80 = arith.constant 0 : index
    %c0_81 = arith.constant 0 : index
    %192 = vector.load %arg5[%c1, %c0_80, %c0_81] : memref<2x64x192xbf16, #tpu.memory_space<vmem>>, vector<1x64x192xbf16>
    %193 = vector.shape_cast %192 : vector<1x64x192xbf16> to vector<64x192xbf16>
    %194 = arith.truncf %191 : vector<8x64xf32> to vector<8x64xbf16>
    %cst_82 = arith.constant dense<0.000000e+00> : vector<8x192xf32>
    %195 = tpu.matmul %194, %193, %cst_82 {dimension_numbers = #tpu.dot_dimension_numbers<[1], [0], [0], [1], [0, 0, 1, 1], [], []>} : vector<8x64xbf16>, vector<64x192xbf16>, vector<8x192xf32> -> vector<8x192xf32>
    %c1_83 = arith.constant 1 : index
    %c0_84 = arith.constant 0 : index
    %c0_85 = arith.constant 0 : index
    %196 = vector.load %arg6[%c1_83, %c0_84, %c0_85] : memref<2x1x192xf32, #tpu.memory_space<vmem>>, vector<1x1x192xf32>
    %197 = vector.shape_cast %196 : vector<1x1x192xf32> to vector<1x192xf32>
    %198 = vector.broadcast %197 : vector<1x192xf32> to vector<8x192xf32>
    %199 = arith.addf %195, %198 : vector<8x192xf32>
    %200 = vector.extract_strided_slice %199 {offsets = [0, 0], sizes = [8, 16], strides = [1, 1]} : vector<8x192xf32> to vector<8x16xf32>
    %201 = vector.extract_strided_slice %199 {offsets = [0, 64], sizes = [8, 16], strides = [1, 1]} : vector<8x192xf32> to vector<8x16xf32>
    %202 = vector.extract_strided_slice %199 {offsets = [0, 128], sizes = [8, 16], strides = [1, 1]} : vector<8x192xf32> to vector<8x16xf32>
    %203 = arith.truncf %200 : vector<8x16xf32> to vector<8x16xbf16>
    %204 = arith.truncf %201 : vector<8x16xf32> to vector<8x16xbf16>
    %cst_86 = arith.constant dense<0.000000e+00> : vector<8x8xf32>
    %205 = tpu.matmul %203, %204, %cst_86 {dimension_numbers = #tpu.dot_dimension_numbers<[1], [1], [0], [0], [0, 0, 1, 0], [], []>} : vector<8x16xbf16>, vector<8x16xbf16>, vector<8x8xf32> -> vector<8x8xf32>
    %cst_87 = arith.constant 2.500000e-01 : f32
    %206 = vector.broadcast %cst_87 : f32 to vector<8x8xf32>
    %207 = arith.mulf %205, %206 : vector<8x8xf32>
    %208 = arith.addf %207, %14 : vector<8x8xf32>
    %cst_88 = arith.constant dense<0xFF800000> : vector<8xf32>
    %209 = vector.multi_reduction <maximumf>, %208, %cst_88 [1] : vector<8x8xf32> to vector<8xf32>
    %210 = vector.shape_cast %209 : vector<8xf32> to vector<8x1xf32>
    %211 = vector.broadcast %210 : vector<8x1xf32> to vector<8x8xf32>
    %212 = arith.subf %208, %211 : vector<8x8xf32>
    %213 = math.exp %212 : vector<8x8xf32>
    %cst_89 = arith.constant dense<0.000000e+00> : vector<8xf32>
    %214 = vector.multi_reduction <add>, %213, %cst_89 [1] : vector<8x8xf32> to vector<8xf32>
    %215 = vector.shape_cast %214 : vector<8xf32> to vector<8x1xf32>
    %216 = tpu.reciprocal %215 {approx = true} : vector<8x1xf32> -> vector<8x1xf32>
    %217 = vector.broadcast %216 : vector<8x1xf32> to vector<8x8xf32>
    %218 = arith.mulf %213, %217 : vector<8x8xf32>
    %219 = arith.truncf %218 : vector<8x8xf32> to vector<8x8xbf16>
    %220 = arith.truncf %202 : vector<8x16xf32> to vector<8x16xbf16>
    %cst_90 = arith.constant dense<0.000000e+00> : vector<8x16xf32>
    %221 = tpu.matmul %219, %220, %cst_90 {dimension_numbers = #tpu.dot_dimension_numbers<[1], [0], [0], [1], [0, 0, 1, 1], [], []>} : vector<8x8xbf16>, vector<8x16xbf16>, vector<8x16xf32> -> vector<8x16xf32>
    %222 = vector.extract_strided_slice %199 {offsets = [0, 16], sizes = [8, 16], strides = [1, 1]} : vector<8x192xf32> to vector<8x16xf32>
    %223 = vector.extract_strided_slice %199 {offsets = [0, 80], sizes = [8, 16], strides = [1, 1]} : vector<8x192xf32> to vector<8x16xf32>
    %224 = vector.extract_strided_slice %199 {offsets = [0, 144], sizes = [8, 16], strides = [1, 1]} : vector<8x192xf32> to vector<8x16xf32>
    %225 = arith.truncf %222 : vector<8x16xf32> to vector<8x16xbf16>
    %226 = arith.truncf %223 : vector<8x16xf32> to vector<8x16xbf16>
    %cst_91 = arith.constant dense<0.000000e+00> : vector<8x8xf32>
    %227 = tpu.matmul %225, %226, %cst_91 {dimension_numbers = #tpu.dot_dimension_numbers<[1], [1], [0], [0], [0, 0, 1, 0], [], []>} : vector<8x16xbf16>, vector<8x16xbf16>, vector<8x8xf32> -> vector<8x8xf32>
    %cst_92 = arith.constant 2.500000e-01 : f32
    %228 = vector.broadcast %cst_92 : f32 to vector<8x8xf32>
    %229 = arith.mulf %227, %228 : vector<8x8xf32>
    %230 = arith.addf %229, %14 : vector<8x8xf32>
    %cst_93 = arith.constant dense<0xFF800000> : vector<8xf32>
    %231 = vector.multi_reduction <maximumf>, %230, %cst_93 [1] : vector<8x8xf32> to vector<8xf32>
    %232 = vector.shape_cast %231 : vector<8xf32> to vector<8x1xf32>
    %233 = vector.broadcast %232 : vector<8x1xf32> to vector<8x8xf32>
    %234 = arith.subf %230, %233 : vector<8x8xf32>
    %235 = math.exp %234 : vector<8x8xf32>
    %cst_94 = arith.constant dense<0.000000e+00> : vector<8xf32>
    %236 = vector.multi_reduction <add>, %235, %cst_94 [1] : vector<8x8xf32> to vector<8xf32>
    %237 = vector.shape_cast %236 : vector<8xf32> to vector<8x1xf32>
    %238 = tpu.reciprocal %237 {approx = true} : vector<8x1xf32> -> vector<8x1xf32>
    %239 = vector.broadcast %238 : vector<8x1xf32> to vector<8x8xf32>
    %240 = arith.mulf %235, %239 : vector<8x8xf32>
    %241 = arith.truncf %240 : vector<8x8xf32> to vector<8x8xbf16>
    %242 = arith.truncf %224 : vector<8x16xf32> to vector<8x16xbf16>
    %cst_95 = arith.constant dense<0.000000e+00> : vector<8x16xf32>
    %243 = tpu.matmul %241, %242, %cst_95 {dimension_numbers = #tpu.dot_dimension_numbers<[1], [0], [0], [1], [0, 0, 1, 1], [], []>} : vector<8x8xbf16>, vector<8x16xbf16>, vector<8x16xf32> -> vector<8x16xf32>
    %244 = vector.extract_strided_slice %199 {offsets = [0, 32], sizes = [8, 16], strides = [1, 1]} : vector<8x192xf32> to vector<8x16xf32>
    %245 = vector.extract_strided_slice %199 {offsets = [0, 96], sizes = [8, 16], strides = [1, 1]} : vector<8x192xf32> to vector<8x16xf32>
    %246 = vector.extract_strided_slice %199 {offsets = [0, 160], sizes = [8, 16], strides = [1, 1]} : vector<8x192xf32> to vector<8x16xf32>
    %247 = arith.truncf %244 : vector<8x16xf32> to vector<8x16xbf16>
    %248 = arith.truncf %245 : vector<8x16xf32> to vector<8x16xbf16>
    %cst_96 = arith.constant dense<0.000000e+00> : vector<8x8xf32>
    %249 = tpu.matmul %247, %248, %cst_96 {dimension_numbers = #tpu.dot_dimension_numbers<[1], [1], [0], [0], [0, 0, 1, 0], [], []>} : vector<8x16xbf16>, vector<8x16xbf16>, vector<8x8xf32> -> vector<8x8xf32>
    %cst_97 = arith.constant 2.500000e-01 : f32
    %250 = vector.broadcast %cst_97 : f32 to vector<8x8xf32>
    %251 = arith.mulf %249, %250 : vector<8x8xf32>
    %252 = arith.addf %251, %14 : vector<8x8xf32>
    %cst_98 = arith.constant dense<0xFF800000> : vector<8xf32>
    %253 = vector.multi_reduction <maximumf>, %252, %cst_98 [1] : vector<8x8xf32> to vector<8xf32>
    %254 = vector.shape_cast %253 : vector<8xf32> to vector<8x1xf32>
    %255 = vector.broadcast %254 : vector<8x1xf32> to vector<8x8xf32>
    %256 = arith.subf %252, %255 : vector<8x8xf32>
    %257 = math.exp %256 : vector<8x8xf32>
    %cst_99 = arith.constant dense<0.000000e+00> : vector<8xf32>
    %258 = vector.multi_reduction <add>, %257, %cst_99 [1] : vector<8x8xf32> to vector<8xf32>
    %259 = vector.shape_cast %258 : vector<8xf32> to vector<8x1xf32>
    %260 = tpu.reciprocal %259 {approx = true} : vector<8x1xf32> -> vector<8x1xf32>
    %261 = vector.broadcast %260 : vector<8x1xf32> to vector<8x8xf32>
    %262 = arith.mulf %257, %261 : vector<8x8xf32>
    %263 = arith.truncf %262 : vector<8x8xf32> to vector<8x8xbf16>
    %264 = arith.truncf %246 : vector<8x16xf32> to vector<8x16xbf16>
    %cst_100 = arith.constant dense<0.000000e+00> : vector<8x16xf32>
    %265 = tpu.matmul %263, %264, %cst_100 {dimension_numbers = #tpu.dot_dimension_numbers<[1], [0], [0], [1], [0, 0, 1, 1], [], []>} : vector<8x8xbf16>, vector<8x16xbf16>, vector<8x16xf32> -> vector<8x16xf32>
    %266 = vector.extract_strided_slice %199 {offsets = [0, 48], sizes = [8, 16], strides = [1, 1]} : vector<8x192xf32> to vector<8x16xf32>
    %267 = vector.extract_strided_slice %199 {offsets = [0, 112], sizes = [8, 16], strides = [1, 1]} : vector<8x192xf32> to vector<8x16xf32>
    %268 = vector.extract_strided_slice %199 {offsets = [0, 176], sizes = [8, 16], strides = [1, 1]} : vector<8x192xf32> to vector<8x16xf32>
    %269 = arith.truncf %266 : vector<8x16xf32> to vector<8x16xbf16>
    %270 = arith.truncf %267 : vector<8x16xf32> to vector<8x16xbf16>
    %cst_101 = arith.constant dense<0.000000e+00> : vector<8x8xf32>
    %271 = tpu.matmul %269, %270, %cst_101 {dimension_numbers = #tpu.dot_dimension_numbers<[1], [1], [0], [0], [0, 0, 1, 0], [], []>} : vector<8x16xbf16>, vector<8x16xbf16>, vector<8x8xf32> -> vector<8x8xf32>
    %cst_102 = arith.constant 2.500000e-01 : f32
    %272 = vector.broadcast %cst_102 : f32 to vector<8x8xf32>
    %273 = arith.mulf %271, %272 : vector<8x8xf32>
    %274 = arith.addf %273, %14 : vector<8x8xf32>
    %cst_103 = arith.constant dense<0xFF800000> : vector<8xf32>
    %275 = vector.multi_reduction <maximumf>, %274, %cst_103 [1] : vector<8x8xf32> to vector<8xf32>
    %276 = vector.shape_cast %275 : vector<8xf32> to vector<8x1xf32>
    %277 = vector.broadcast %276 : vector<8x1xf32> to vector<8x8xf32>
    %278 = arith.subf %274, %277 : vector<8x8xf32>
    %279 = math.exp %278 : vector<8x8xf32>
    %cst_104 = arith.constant dense<0.000000e+00> : vector<8xf32>
    %280 = vector.multi_reduction <add>, %279, %cst_104 [1] : vector<8x8xf32> to vector<8xf32>
    %281 = vector.shape_cast %280 : vector<8xf32> to vector<8x1xf32>
    %282 = tpu.reciprocal %281 {approx = true} : vector<8x1xf32> -> vector<8x1xf32>
    %283 = vector.broadcast %282 : vector<8x1xf32> to vector<8x8xf32>
    %284 = arith.mulf %279, %283 : vector<8x8xf32>
    %285 = arith.truncf %284 : vector<8x8xf32> to vector<8x8xbf16>
    %286 = arith.truncf %268 : vector<8x16xf32> to vector<8x16xbf16>
    %cst_105 = arith.constant dense<0.000000e+00> : vector<8x16xf32>
    %287 = tpu.matmul %285, %286, %cst_105 {dimension_numbers = #tpu.dot_dimension_numbers<[1], [0], [0], [1], [0, 0, 1, 1], [], []>} : vector<8x8xbf16>, vector<8x16xbf16>, vector<8x16xf32> -> vector<8x16xf32>
    %288 = tpu.concatenate %221, %243, %265, %287 in 1 : vector<8x16xf32>, vector<8x16xf32>, vector<8x16xf32>, vector<8x16xf32> -> vector<8x64xf32>
    %c1_106 = arith.constant 1 : index
    %c0_107 = arith.constant 0 : index
    %c0_108 = arith.constant 0 : index
    %289 = vector.load %arg7[%c1_106, %c0_107, %c0_108] : memref<2x64x64xbf16, #tpu.memory_space<vmem>>, vector<1x64x64xbf16>
    %290 = vector.shape_cast %289 : vector<1x64x64xbf16> to vector<64x64xbf16>
    %291 = arith.truncf %288 : vector<8x64xf32> to vector<8x64xbf16>
    %cst_109 = arith.constant dense<0.000000e+00> : vector<8x64xf32>
    %292 = tpu.matmul %291, %290, %cst_109 {dimension_numbers = #tpu.dot_dimension_numbers<[1], [0], [0], [1], [0, 0, 1, 1], [], []>} : vector<8x64xbf16>, vector<64x64xbf16>, vector<8x64xf32> -> vector<8x64xf32>
    %c1_110 = arith.constant 1 : index
    %c0_111 = arith.constant 0 : index
    %c0_112 = arith.constant 0 : index
    %293 = vector.load %arg8[%c1_110, %c0_111, %c0_112] : memref<2x1x64xf32, #tpu.memory_space<vmem>>, vector<1x1x64xf32>
    %294 = vector.shape_cast %293 : vector<1x1x64xf32> to vector<1x64xf32>
    %295 = vector.broadcast %294 : vector<1x64xf32> to vector<8x64xf32>
    %296 = arith.addf %292, %295 : vector<8x64xf32>
    %297 = arith.addf %191, %296 : vector<8x64xf32>
    %c1_113 = arith.constant 1 : index
    %c0_114 = arith.constant 0 : index
    %c0_115 = arith.constant 0 : index
    %298 = vector.load %arg9[%c1_113, %c0_114, %c0_115] : memref<2x1x64xf32, #tpu.memory_space<vmem>>, vector<1x1x64xf32>
    %299 = vector.shape_cast %298 : vector<1x1x64xf32> to vector<1x64xf32>
    %c1_116 = arith.constant 1 : index
    %c0_117 = arith.constant 0 : index
    %c0_118 = arith.constant 0 : index
    %300 = vector.load %arg10[%c1_116, %c0_117, %c0_118] : memref<2x1x64xf32, #tpu.memory_space<vmem>>, vector<1x1x64xf32>
    %301 = vector.shape_cast %300 : vector<1x1x64xf32> to vector<1x64xf32>
    %cst_119 = arith.constant dense<0.000000e+00> : vector<8xf32>
    %302 = vector.multi_reduction <add>, %297, %cst_119 [1] : vector<8x64xf32> to vector<8xf32>
    %303 = vector.shape_cast %302 : vector<8xf32> to vector<8x1xf32>
    %cst_120 = arith.constant 6.400000e+01 : f32
    %304 = vector.broadcast %cst_120 : f32 to vector<8x1xf32>
    %305 = arith.divf %303, %304 : vector<8x1xf32>
    %306 = vector.broadcast %305 : vector<8x1xf32> to vector<8x64xf32>
    %307 = arith.subf %297, %306 : vector<8x64xf32>
    %308 = arith.mulf %307, %307 : vector<8x64xf32>
    %cst_121 = arith.constant dense<0.000000e+00> : vector<8xf32>
    %309 = vector.multi_reduction <add>, %308, %cst_121 [1] : vector<8x64xf32> to vector<8xf32>
    %310 = vector.shape_cast %309 : vector<8xf32> to vector<8x1xf32>
    %cst_122 = arith.constant 6.400000e+01 : f32
    %311 = vector.broadcast %cst_122 : f32 to vector<8x1xf32>
    %312 = arith.divf %310, %311 : vector<8x1xf32>
    %313 = vector.broadcast %305 : vector<8x1xf32> to vector<8x64xf32>
    %314 = arith.subf %297, %313 : vector<8x64xf32>
    %cst_123 = arith.constant 9.99999974E-6 : f32
    %315 = vector.broadcast %cst_123 : f32 to vector<8x1xf32>
    %316 = arith.addf %312, %315 : vector<8x1xf32>
    %317 = math.rsqrt %316 : vector<8x1xf32>
    %318 = vector.broadcast %317 : vector<8x1xf32> to vector<8x64xf32>
    %319 = arith.mulf %314, %318 : vector<8x64xf32>
    %320 = vector.broadcast %299 : vector<1x64xf32> to vector<8x64xf32>
    %321 = arith.mulf %319, %320 : vector<8x64xf32>
    %322 = vector.broadcast %301 : vector<1x64xf32> to vector<8x64xf32>
    %323 = arith.addf %321, %322 : vector<8x64xf32>
    %c1_124 = arith.constant 1 : index
    %c0_125 = arith.constant 0 : index
    %c0_126 = arith.constant 0 : index
    %324 = vector.load %arg11[%c1_124, %c0_125, %c0_126] : memref<2x64x128xbf16, #tpu.memory_space<vmem>>, vector<1x64x128xbf16>
    %325 = vector.shape_cast %324 : vector<1x64x128xbf16> to vector<64x128xbf16>
    %326 = arith.truncf %323 : vector<8x64xf32> to vector<8x64xbf16>
    %cst_127 = arith.constant dense<0.000000e+00> : vector<8x128xf32>
    %327 = tpu.matmul %326, %325, %cst_127 {dimension_numbers = #tpu.dot_dimension_numbers<[1], [0], [0], [1], [0, 0, 1, 1], [], []>} : vector<8x64xbf16>, vector<64x128xbf16>, vector<8x128xf32> -> vector<8x128xf32>
    %c1_128 = arith.constant 1 : index
    %c0_129 = arith.constant 0 : index
    %c0_130 = arith.constant 0 : index
    %328 = vector.load %arg12[%c1_128, %c0_129, %c0_130] : memref<2x1x128xf32, #tpu.memory_space<vmem>>, vector<1x1x128xf32>
    %329 = vector.shape_cast %328 : vector<1x1x128xf32> to vector<1x128xf32>
    %330 = vector.broadcast %329 : vector<1x128xf32> to vector<8x128xf32>
    %331 = arith.addf %327, %330 : vector<8x128xf32>
    %cst_131 = arith.constant 0.000000e+00 : f32
    %332 = vector.broadcast %cst_131 : f32 to vector<8x128xf32>
    %333 = arith.maximumf %331, %332 : vector<8x128xf32>
    %c1_132 = arith.constant 1 : index
    %c0_133 = arith.constant 0 : index
    %c0_134 = arith.constant 0 : index
    %334 = vector.load %arg13[%c1_132, %c0_133, %c0_134] : memref<2x128x64xbf16, #tpu.memory_space<vmem>>, vector<1x128x64xbf16>
    %335 = vector.shape_cast %334 : vector<1x128x64xbf16> to vector<128x64xbf16>
    %336 = arith.truncf %333 : vector<8x128xf32> to vector<8x128xbf16>
    %cst_135 = arith.constant dense<0.000000e+00> : vector<8x64xf32>
    %337 = tpu.matmul %336, %335, %cst_135 {dimension_numbers = #tpu.dot_dimension_numbers<[1], [0], [0], [1], [0, 0, 1, 1], [], []>} : vector<8x128xbf16>, vector<128x64xbf16>, vector<8x64xf32> -> vector<8x64xf32>
    %c1_136 = arith.constant 1 : index
    %c0_137 = arith.constant 0 : index
    %c0_138 = arith.constant 0 : index
    %338 = vector.load %arg14[%c1_136, %c0_137, %c0_138] : memref<2x1x64xf32, #tpu.memory_space<vmem>>, vector<1x1x64xf32>
    %339 = vector.shape_cast %338 : vector<1x1x64xf32> to vector<1x64xf32>
    %340 = vector.broadcast %339 : vector<1x64xf32> to vector<8x64xf32>
    %341 = arith.addf %337, %340 : vector<8x64xf32>
    %342 = arith.addf %323, %341 : vector<8x64xf32>
    %c1_139 = arith.constant 1 : index
    %c0_140 = arith.constant 0 : index
    %c0_141 = arith.constant 0 : index
    %343 = vector.load %arg15[%c1_139, %c0_140, %c0_141] : memref<2x1x64xf32, #tpu.memory_space<vmem>>, vector<1x1x64xf32>
    %344 = vector.shape_cast %343 : vector<1x1x64xf32> to vector<1x64xf32>
    %c1_142 = arith.constant 1 : index
    %c0_143 = arith.constant 0 : index
    %c0_144 = arith.constant 0 : index
    %345 = vector.load %arg16[%c1_142, %c0_143, %c0_144] : memref<2x1x64xf32, #tpu.memory_space<vmem>>, vector<1x1x64xf32>
    %346 = vector.shape_cast %345 : vector<1x1x64xf32> to vector<1x64xf32>
    %cst_145 = arith.constant dense<0.000000e+00> : vector<8xf32>
    %347 = vector.multi_reduction <add>, %342, %cst_145 [1] : vector<8x64xf32> to vector<8xf32>
    %348 = vector.shape_cast %347 : vector<8xf32> to vector<8x1xf32>
    %cst_146 = arith.constant 6.400000e+01 : f32
    %349 = vector.broadcast %cst_146 : f32 to vector<8x1xf32>
    %350 = arith.divf %348, %349 : vector<8x1xf32>
    %351 = vector.broadcast %350 : vector<8x1xf32> to vector<8x64xf32>
    %352 = arith.subf %342, %351 : vector<8x64xf32>
    %353 = arith.mulf %352, %352 : vector<8x64xf32>
    %cst_147 = arith.constant dense<0.000000e+00> : vector<8xf32>
    %354 = vector.multi_reduction <add>, %353, %cst_147 [1] : vector<8x64xf32> to vector<8xf32>
    %355 = vector.shape_cast %354 : vector<8xf32> to vector<8x1xf32>
    %cst_148 = arith.constant 6.400000e+01 : f32
    %356 = vector.broadcast %cst_148 : f32 to vector<8x1xf32>
    %357 = arith.divf %355, %356 : vector<8x1xf32>
    %358 = vector.broadcast %350 : vector<8x1xf32> to vector<8x64xf32>
    %359 = arith.subf %342, %358 : vector<8x64xf32>
    %cst_149 = arith.constant 9.99999974E-6 : f32
    %360 = vector.broadcast %cst_149 : f32 to vector<8x1xf32>
    %361 = arith.addf %357, %360 : vector<8x1xf32>
    %362 = math.rsqrt %361 : vector<8x1xf32>
    %363 = vector.broadcast %362 : vector<8x1xf32> to vector<8x64xf32>
    %364 = arith.mulf %359, %363 : vector<8x64xf32>
    %365 = vector.broadcast %344 : vector<1x64xf32> to vector<8x64xf32>
    %366 = arith.mulf %364, %365 : vector<8x64xf32>
    %367 = vector.broadcast %346 : vector<1x64xf32> to vector<8x64xf32>
    %368 = arith.addf %366, %367 : vector<8x64xf32>
    %c0_150 = arith.constant 0 : index
    %c0_151 = arith.constant 0 : index
    %369 = vector.load %arg17[%c0_150, %c0_151] : memref<64x128xbf16, #tpu.memory_space<vmem>>, vector<64x128xbf16>
    %370 = arith.truncf %368 : vector<8x64xf32> to vector<8x64xbf16>
    %cst_152 = arith.constant dense<0.000000e+00> : vector<8x128xf32>
    %371 = tpu.matmul %370, %369, %cst_152 {dimension_numbers = #tpu.dot_dimension_numbers<[1], [0], [0], [1], [0, 0, 1, 1], [], []>} : vector<8x64xbf16>, vector<64x128xbf16>, vector<8x128xf32> -> vector<8x128xf32>
    %c0_153 = arith.constant 0 : index
    %c0_154 = arith.constant 0 : index
    %372 = vector.load %arg18[%c0_153, %c0_154] : memref<1x128xf32, #tpu.memory_space<vmem>>, vector<1x128xf32>
    %373 = vector.broadcast %372 : vector<1x128xf32> to vector<8x128xf32>
    %374 = arith.addf %371, %373 : vector<8x128xf32>
    %c0_155 = arith.constant 0 : index
    %c0_156 = arith.constant 0 : index
    %375 = vector.load %arg19[%c0_155, %c0_156] : memref<8x128xf32, #tpu.memory_space<vmem>>, vector<8x128xf32>
    tpu.vector_store %arg19[%c0_155, %c0_156], %374 {strides = array<i32>} : memref<8x128xf32, #tpu.memory_space<vmem>>, vector<8x128xf32>,
    return
  }
  func.func @transform_0(%arg0: i32) -> (i32, i32) {
    %c0_i32 = arith.constant 0 : i32
    %c0_i32_0 = arith.constant 0 : i32
    return %arg0, %c0_i32 : i32, i32
  }
  func.func @transform_1(%arg0: i32) -> (i32, i32) {
    %c0_i32 = arith.constant 0 : i32
    %c0_i32_0 = arith.constant 0 : i32
    return %arg0, %c0_i32 : i32, i32
  }
  func.func @transform_2(%arg0: i32) -> (i32, i32, i32) {
    %c0_i32 = arith.constant 0 : i32
    %c0_i32_0 = arith.constant 0 : i32
    %c0_i32_1 = arith.constant 0 : i32
    return %arg0, %c0_i32, %c0_i32_0 : i32, i32, i32
  }
  func.func @transform_3(%arg0: i32) -> (i32, i32) {
    %c0_i32 = arith.constant 0 : i32
    %c0_i32_0 = arith.constant 0 : i32
    %c0_i32_1 = arith.constant 0 : i32
    return %c0_i32, %c0_i32_0 : i32, i32
  }
  func.func @transform_4(%arg0: i32) -> (i32, i32, i32) {
    %c0_i32 = arith.constant 0 : i32
    %c0_i32_0 = arith.constant 0 : i32
    %c0_i32_1 = arith.constant 0 : i32
    %c0_i32_2 = arith.constant 0 : i32
    return %c0_i32, %c0_i32_0, %c0_i32_1 : i32, i32, i32
  }
  func.func @transform_5(%arg0: i32) -> (i32, i32, i32) {
    %c0_i32 = arith.constant 0 : i32
    %c0_i32_0 = arith.constant 0 : i32
    %c0_i32_1 = arith.constant 0 : i32
    %c0_i32_2 = arith.constant 0 : i32
    return %c0_i32, %c0_i32_0, %c0_i32_1 : i32, i32, i32
  }
  func.func @transform_6(%arg0: i32) -> (i32, i32, i32) {
    %c0_i32 = arith.constant 0 : i32
    %c0_i32_0 = arith.constant 0 : i32
    %c0_i32_1 = arith.constant 0 : i32
    %c0_i32_2 = arith.constant 0 : i32
    return %c0_i32, %c0_i32_0, %c0_i32_1 : i32, i32, i32
  }
  func.func @transform_7(%arg0: i32) -> (i32, i32, i32) {
    %c0_i32 = arith.constant 0 : i32
    %c0_i32_0 = arith.constant 0 : i32
    %c0_i32_1 = arith.constant 0 : i32
    %c0_i32_2 = arith.constant 0 : i32
    return %c0_i32, %c0_i32_0, %c0_i32_1 : i32, i32, i32
  }
  func.func @transform_8(%arg0: i32) -> (i32, i32, i32) {
    %c0_i32 = arith.constant 0 : i32
    %c0_i32_0 = arith.constant 0 : i32
    %c0_i32_1 = arith.constant 0 : i32
    %c0_i32_2 = arith.constant 0 : i32
    return %c0_i32, %c0_i32_0, %c0_i32_1 : i32, i32, i32
  }
  func.func @transform_9(%arg0: i32) -> (i32, i32, i32) {
    %c0_i32 = arith.constant 0 : i32
    %c0_i32_0 = arith.constant 0 : i32
    %c0_i32_1 = arith.constant 0 : i32
    %c0_i32_2 = arith.constant 0 : i32
    return %c0_i32, %c0_i32_0, %c0_i32_1 : i32, i32, i32
  }
  func.func @transform_10(%arg0: i32) -> (i32, i32, i32) {
    %c0_i32 = arith.constant 0 : i32
    %c0_i32_0 = arith.constant 0 : i32
    %c0_i32_1 = arith.constant 0 : i32
    %c0_i32_2 = arith.constant 0 : i32
    return %c0_i32, %c0_i32_0, %c0_i32_1 : i32, i32, i32
  }
  func.func @transform_11(%arg0: i32) -> (i32, i32, i32) {
    %c0_i32 = arith.constant 0 : i32
    %c0_i32_0 = arith.constant 0 : i32
    %c0_i32_1 = arith.constant 0 : i32
    %c0_i32_2 = arith.constant 0 : i32
    return %c0_i32, %c0_i32_0, %c0_i32_1 : i32, i32, i32
  }
  func.func @transform_12(%arg0: i32) -> (i32, i32, i32) {
    %c0_i32 = arith.constant 0 : i32
    %c0_i32_0 = arith.constant 0 : i32
    %c0_i32_1 = arith.constant 0 : i32
    %c0_i32_2 = arith.constant 0 : i32
    return %c0_i32, %c0_i32_0, %c0_i32_1 : i32, i32, i32
  }
  func.func @transform_13(%arg0: i32) -> (i32, i32, i32) {
    %c0_i32 = arith.constant 0 : i32
    %c0_i32_0 = arith.constant 0 : i32
    %c0_i32_1 = arith.constant 0 : i32
    %c0_i32_2 = arith.constant 0 : i32
    return %c0_i32, %c0_i32_0, %c0_i32_1 : i32, i32, i32
  }
  func.func @transform_14(%arg0: i32) -> (i32, i32, i32) {
    %c0_i32 = arith.constant 0 : i32
    %c0_i32_0 = arith.constant 0 : i32
    %c0_i32_1 = arith.constant 0 : i32
    %c0_i32_2 = arith.constant 0 : i32
    return %c0_i32, %c0_i32_0, %c0_i32_1 : i32, i32, i32
  }
  func.func @transform_15(%arg0: i32) -> (i32, i32, i32) {
    %c0_i32 = arith.constant 0 : i32
    %c0_i32_0 = arith.constant 0 : i32
    %c0_i32_1 = arith.constant 0 : i32
    %c0_i32_2 = arith.constant 0 : i32
    return %c0_i32, %c0_i32_0, %c0_i32_1 : i32, i32, i32
  }
  func.func @transform_16(%arg0: i32) -> (i32, i32) {
    %c0_i32 = arith.constant 0 : i32
    %c0_i32_0 = arith.constant 0 : i32
    %c0_i32_1 = arith.constant 0 : i32
    return %c0_i32, %c0_i32_0 : i32, i32
  }
  func.func @transform_17(%arg0: i32) -> (i32, i32) {
    %c0_i32 = arith.constant 0 : i32
    %c0_i32_0 = arith.constant 0 : i32
    %c0_i32_1 = arith.constant 0 : i32
    return %c0_i32, %c0_i32_0 : i32, i32
  }
  func.func @transform_18(%arg0: i32) -> (i32, i32) {
    %c0_i32 = arith.constant 0 : i32
    %c0_i32_0 = arith.constant 0 : i32
    return %arg0, %c0_i32 : i32, i32
  }
}

</mosaic_0001>

<bundles_post_ra>
// kernel: transformer_lm_forward.1
= control target key start
LH: loop header
LB: loop body
LE: loop exit
PB: predicated region body
PF: predicated region fallthrough
CT: control target
= control target key end

     0   :  { %s3238_s0 = inlined_call_operand.vmem [shape: s32[16,1], index: 0, kind: input, shape index: {}]   ;;  %s3239_s1 = inlined_call_operand.vmem [shape: f32[16,64], index: 1, kind: input, shape index: {}]   ;;  %s3240_s2 = inlined_call_operand.vmem [shape: f32[2,8,8], index: 2, kind: input, shape index: {}]   ;;  %s3241_s3 = inlined_call_operand.vmem [shape: bf16[128,64], index: 3, kind: input, shape index: {}]   ;;  %s3242_s4 = inlined_call_operand.vmem [shape: bf16[2,64,192], index: 4, kind: input, shape index: {}]   ;;  %s3243_s5 = inlined_call_operand.vmem [shape: f32[2,1,192], index: 5, kind: input, shape index: {}]   ;;  %s3244_s6 = inlined_call_operand.vmem [shape: bf16[2,64,64], index: 6, kind: input, shape index: {}]   ;;  %s3245_s7 = inlined_call_operand.vmem [shape: f32[2,1,64], index: 7, kind: input, shape index: {}]   ;;  %s3246_s8 = inlined_call_operand.vmem [shape: f32[2,1,64], index: 8, kind: input, shape index: {}]   ;;  %s3247_s9 = inlined_call_operand.vmem [shape: f32[2,1,64], index: 9, kind: input, shape index: {}]   ;;  %s3248_s10 = inlined_call_operand.vmem [shape: bf16[2,64,128], index: 10, kind: input, shape index: {}]   ;;  %s3249_s11 = inlined_call_operand.vmem [shape: f32[2,1,128], index: 11, kind: input, shape index: {}]   ;;  %s3250_s12 = inlined_call_operand.vmem [shape: bf16[2,128,64], index: 12, kind: input, shape index: {}]   ;;  %s3251_s13 = inlined_call_operand.vmem [shape: f32[2,1,64], index: 13, kind: input, shape index: {}]   ;;  %s3252_s14 = inlined_call_operand.vmem [shape: f32[2,1,64], index: 14, kind: input, shape index: {}]   ;;  %s3253_s15 = inlined_call_operand.vmem [shape: f32[2,1,64], index: 15, kind: input, shape index: {}]   ;;  %s3254_s16 = inlined_call_operand.vmem [shape: bf16[64,128], index: 16, kind: input, shape index: {}]   ;;  %s3255_s17 = inlined_call_operand.vmem [shape: f32[1,128], index: 17, kind: input, shape index: {}]   ;;  %s3256_s18 = inlined_call_operand.hbm [shape: f32[16,128], index: 18, kind: output, shape index: {}]  }
   0x1   :  { %3272 = sst [smem:[#allocation11_spill]] %s3238_s0 }
   0x2   :  { %3273 = sst [smem:[#allocation12_spill]] %s3239_s1 }
   0x3   :  { %3274 = sst [smem:[#allocation13_spill]] %s3240_s2 }
   0x4   :  { %3275 = sst [smem:[#allocation14_spill]] %s3241_s3 }
   0x5   :  { %23 = vsyncpa [#allocation3], 0 }
   0x6   :  { %25 = vsyncpa [#allocation3 + $0x1], 0  ;;  %s2711_s27 = smov 0   ;;  %s2713_s28 = smov 0  }
   0x7   :  { %s2715_s29 = smov 0   ;;  %s2717_s30 = smov 0  }
   0x8 LB: > { %3276 = sst [smem:[#allocation5_spill]] %s2592_s27  ;;  %s2732_s0 = sadd.s32 4294967295, %s2604_s30   ;;  %s2604_s30 = sphi %s2717_s30, %s3296_s30   ;;  %s2600_s29 = sphi %s2715_s29, %s3298_s29   ;;  %s2596_s28 = sphi %s2713_s28, %s3300_s28   ;;  %s2592_s27 = sphi %s2711_s27, %s3299_s27  }
   0x9   : > { %3277 = sst [smem:[#allocation6_spill]] %s2600_s29  ;;  %s2047_s19 = sadd.s32 4294967294, %s2604_s30  }
   0xa   : > { %3278 = sst [smem:[#allocation7_spill]] %s2604_s30  ;;  %s2736_s1 = sadd.s32 1, %s2604_s30  }
   0xb   : > { %3279 = sst [smem:[#allocation8_spill]] %s2736_s1  ;;  %s431_s20 = sadd.s32 1, %s2600_s29 }
   0xc   : > { %s428_s21 = ssub.s32 %s2604_s30, %s2736_s1  ;;  %p441_p0 = scmp.ne.s32.totalorder %s2600_s29, %s2596_s28 }
   0xd   : > { %p429_p1 = scmp.eq.s32.totalorder %s428_s21, 0  ;;  %p442_p2 = scmp.eq.s32.totalorder %s2732_s0, 1 }
   0xe   : > { %p447_p3 = scmp.ne.s32.totalorder %s2596_s28, %s2592_s27  ;;  %p448_p4 = scmp.eq.s32.totalorder %s2047_s19, 1 }
   0xf   : > { %s2747_s22 = scalar_select %p429_p1, %s2600_s29, %s431_s20  }
  0x10   : > { %p2749_p5 = por %p442_p2, %p441_p0  ;;  %p2753_p6 = por %p448_p4, %p447_p3 }
  0x11   : > { %3280 = sst [smem:[#allocation9_spill]] %s2747_s22  ;;  %p2050_p7 = scmp.ge.s32.totalorder %s2604_s30, 1 }
  0x12   : > { %s3282_s23 = scalar_select %p2753_p6, 1, 0 }
  0x13   : > { %p532_p8 = scmp.lt.s32.totalorder %s2604_s30, 3 }
  0x14   : > { %3283 = sst [smem:[#allocation10_spill]] %s3282_s23 }
  0x15   : > { %p533_p9 = pnand %p2050_p7, %p532_p8 }
  0x16   : > { %p593_p10 = scmp.lt.s32.totalorder (!%p533_p9), %s2732_s0, 1  ;;  %s3284_s3 = sld [smem:[#allocation14_spill]] (!%p533_p9) }
  0x17   : > { %536 = sbr.rel (%p533_p9) target bundleno = 4514 (0x11a2), region = 92  ;;  %s3285_s1 = sld [smem:[#allocation11_spill]] (!%p533_p9) }
  0x18   : > { %s3286_s24 = sld [smem:[#allocation12_spill]] (!%p533_p9)  ;;  %s2608_s29 = smov (!%p533_p9), 48  }
  0x19   : > { %s2610_s22 = smov (!%p533_p9), 112   ;;  %s3265_s27 = smov (!%p533_p9), 32  }
  0x1a   : > { %s3263_s20 = smov (!%p533_p9), 80   ;;  %s3290_s19 = smov (!%p533_p9), 96  }
  0x1b   : > { %s3291_s30 = smov (!%p533_p9), 32  }
  0x1c   : > { %v2382_v0 = vld [vmem:[%s3284_s3 + $0x38] sm:$0xff]  ;;  %v2606_v1 = vmov 0   ;;  %s594_s26 = scalar_select %p593_p10, %s2732_s0, 1  ;;  %v2381_v2 = vld [vmem:[%s3284_s3 + $0x30] sm:$0xff]  ;;  %v2380_v4 = vld [vmem:[%s3284_s3 + $0x28] sm:$0xff]  ;;  %v607_v22 = vlaneseq  ;;  %vm752_vm2 = vcmask 523264  }
  0x1d   : > { %2484 = vset.pattern.permute.xlu0 %v2606_v1  ;;  %680 = vmatpush.bf16.msra.mxu0 %v2382_v0  ;;  %v2379_v5 = vld [vmem:[%s3284_s3 + $0x20] sm:$0xff]  ;;  %v2378_v6 = vld [vmem:[%s3284_s3 + $0x18] sm:$0xff]  ;;  %v2377_v7 = vld [vmem:[%s3284_s3 + $0x10] sm:$0xff]  ;;  %v2607_v25 = vmov 1.0|1.0   ;;  %vm825_vm3 = vcmask 1043456  }
  0x1e   : > { %s2767_s21 = sshll.u32 %s594_s26, 3  ;;  %v2376_v8 = vld [vmem:[%s3284_s3 + $0x8] sm:$0xff]  ;;  %v2375_v9 = vld [vmem:[%s3284_s3] sm:$0xff]  ;;  %v2116_v10 = vld [vmem:[%s3242_s4 + $0x30] sm:$0xf]  ;;  %v608_v23 = vand.u32 127, %v607_v22 }
  0x1f   : > { %s596_s23 = scalar_lea.vmem %s3285_s1, %s2767_s21  ;;  %v2390_v11 = vld [vmem:[%s3242_s4 + $0x34] sm:$0xf0]  ;;  %v2389_v12 = vld [vmem:[%s3242_s4 + $0x34] sm:$0xf]  ;;  %v2118_v14 = vld [vmem:[%s3242_s4 + $0x38] sm:$0xf0]  ;;  %s600_s25 = scalar_lea.vmem %s3286_s24, %s2767_s21 }
  0x20   : > { %v606_v3 = vld [vmem:[%s596_s23] sm:$0xff]  ;;  %v2117_v13 = vor.u32 %v2390_v11, %v2116_v10  ;;  %v2388_v16 = vld [vmem:[%s3242_s4 + $0x24] sm:$0xf0]  ;;  %v2121_v17 = vor.u32 %v2389_v12, %v2118_v14  ;;  %v2110_v19 = vld [vmem:[%s3242_s4 + $0x28] sm:$0xf0]  ;;  %s3271_s1 = smov 64  }
  0x21   : > { %681 = vmatpush.bf16.msra.mxu0 %v2381_v2  ;;  %610 = vperm.xlu0 %2484, %v606_v3   ;;  %v2108_v15 = vld [vmem:[%s3242_s4 + $0x20] sm:$0xf]  ;;  %v2387_v18 = vld [vmem:[%s3242_s4 + $0x24] sm:$0xf]  ;;  %v2100_v26 = vld [vmem:[%s3242_s4 + $0x10] sm:$0xf] }
  0x22   : > { %760 = vmatpush.bf16.msra.mxu1 %v2117_v13  ;;  %v2109_v20 = vor.u32 %v2388_v16, %v2108_v15  ;;  %773 = vmatpush.bf16.msra.mxu2 %v2121_v17  ;;  %v2113_v21 = vor.u32 %v2387_v18, %v2110_v19  ;;  %v2386_v27 = vld [vmem:[%s3242_s4 + $0x14] sm:$0xf0]  ;;  %v2385_v28 = vld [vmem:[%s3242_s4 + $0x14] sm:$0xf]  ;;  %v2102_v30 = vld [vmem:[%s3242_s4 + $0x18] sm:$0xf0] }
  0x23   : > { %v2101_v29 = vor.u32 %v2386_v27, %v2100_v26  ;;  %v2105_v31 = vor.u32 %v2385_v28, %v2102_v30  ;;  %v2092_v32 = vld [vmem:[%s3242_s4] sm:$0xf]  ;;  %v2384_v33 = vld [vmem:[%s3242_s4 + $0x4] sm:$0xf0]  ;;  %v2383_v35 = vld [vmem:[%s3242_s4 + $0x4] sm:$0xf] }
  0x24   : > { %v2093_v34 = vor.u32 %v2384_v33, %v2092_v32  ;;  %v2094_v36 = vld [vmem:[%s3242_s4 + $0x8] sm:$0xf0]  ;;  %v694_v39 = vld [vmem:[%s600_s25] sm:$0xff]  ;;  %s3267_s23 = smov 96   ;;  %vm786_vm4 = vcmask 130048   ;;  %s3287_s25 = sld [smem:[#allocation13_spill]] }
  0x25   : > { %682 = vmatpush.bf16.msra.mxu0 %v2380_v4  ;;  %v2097_v37 = vor.u32 %v2383_v35, %v2094_v36  ;;  %v706_v44 = vld [vmem:[%s3243_s5] sm:$0x3]  ;;  %vm808_vm5 = vcmask 64512   ;;  %vm1030_vm6 = vcmask 261120   ;;  %vm1032_vm7 = vcmask 392192  }
  0x26   : > { %761 = vmatpush.bf16.msra.mxu1 %v2109_v20  ;;  %774 = vmatpush.bf16.msra.mxu2 %v2113_v21  ;;  %v708_v45 = vperm.slane %v706_v44, 0  ;;  %v709_v49 = vperm.slane %v706_v44, 1 }
  0x29   : > { %683 = vmatpush.bf16.msra.mxu0 %v2379_v5 }
  0x2a   : > { %762 = vmatpush.bf16.msra.mxu1 %v2101_v29  ;;  %775 = vmatpush.bf16.msra.mxu2 %v2105_v31  ;;  %s604_s26 = scalar_lea.vmem %s3287_s25, %s2767_s21  ;;  %s3269_s21 = smov 16  }
  0x2b   : > { %v2880_v63 = vld [vmem:[%s604_s26] sm:$0xff]  ;;  %s3288_s25 = smov 64   ;;  %s3289_s26 = smov 16  }
  0x2d   : > { %684 = vmatpush.bf16.msra.mxu0 %v2378_v6 }
  0x2e   : > { %763 = vmatpush.bf16.msra.mxu1 %v2093_v34  ;;  %776 = vmatpush.bf16.msra.mxu2 %v2097_v37 }
  0x31   : > { %685 = vmatpush.bf16.msra.mxu0 %v2377_v7 }
  0x35   : > { %686 = vmatpush.bf16.msra.mxu0 %v2376_v8 }
  0x39   : > { %687 = vmatpush.bf16.msra.mxu0 %v2375_v9 }
  0x93   : > { %v611_v24 = vpop.permute.xlu0 %610 }
  0x94   : > { %vm612_vm0 = vcmp.eq.s32.totalorder %v611_v24, %v608_v23 }
  0x95   : > { %vm2088_vm1 = vmpackc.low %vm612_vm0, %vm612_vm0 }
  0x96   : > { %2089 = vmatmul.msk.bf16.vlgmr.msra.gmra.mxu0 %vm2088_vm1, %v2607_v25 }
 0x113   : > { %v689_v38 = vpop.f32.mrf.mxu0 }
 0x114   : > { %v693_v40 = vmul.f32 8.0, %v689_v38 }
 0x116   : > { %v2843_v41 = vadd.f32 %v694_v39, %v693_v40 }
 0x118   : > { %v705_v42 = vpack.c.bf16 %v2843_v41, %v2843_v41 }
 0x11a   : > { %2122 = vmatmul.msk.bf16.vlgmr.msra.gmra.mxu1 %vm752_vm2, %v705_v42  ;;  %2123 = vmatmul.msk.bf16.vlgmr.msra.gmra.mxu2 %vm752_vm2, %v705_v42 }
 0x11b   : > { %v691_v43 = vpop.f32.mrf.mxu0 }
 0x197   : > { %v765_v46 = vpop.f32.mrf.mxu1 }
 0x198   : > { %v766_v47 = vadd.f32 %v765_v46, %v708_v45 }
 0x19a   : > { %v2852_v48 = vpack.c.bf16 %v766_v47, %v766_v47 }
 0x19c   : > { %844 = vrot.lane.b32.xlu2 %v2852_v48, %s2608_s29  ;;  %784 = vrot.lane.b32.xlu0 %v2852_v48, %s3271_s1 }
 0x19d   : > { %v778_v50 = vpop.f32.mrf.mxu2 }
 0x19e   : > { %v779_v51 = vadd.f32 %v778_v50, %v709_v49 }
 0x19f   : > { %v767_v52 = vpop.f32.mrf.mxu1 }
 0x1a0   : > { %v2858_v53 = vpack.c.bf16 %v779_v51, %v779_v51 }
 0x1a2   : > { %v827_v54 = vsel %vm825_vm3, %v2858_v53, 0 }
 0x1a3   : > { %836 = vmatpush.bf16.msra.mxu3 %v827_v54 }
 0x1a4   : > { %842 = vrot.lane.b32.xlu2 %v2852_v48, %s2610_s22  ;;  %903 = vrot.lane.b32.xlu0 %v2852_v48, %s3265_s27 }
 0x1a5   : > { %v780_v55 = vpop.f32.mrf.mxu2 }
 0x1ac   : > { %901 = vrot.lane.b32.xlu2 %v2852_v48, %s3267_s23  ;;  %959 = vrot.lane.b32.xlu0 %v2852_v48, %s3263_s20 }
 0x1f6   : > { %v845_v56 = vpop.permute.xlu2 %844 }
 0x1f7   : > { %v850_v59 = vsel %vm786_vm4, %v845_v56, 0 }
 0x1fe   : > { %v843_v62 = vpop.permute.xlu2 %842 }
 0x206   : > { %v902_v13 = vpop.permute.xlu2 %901 }
 0x20e   : > { %v785_v57 = vpop.permute.xlu0 %784 }
 0x20f   : > { %v791_v58 = vsel %vm786_vm4, %v785_v57, 0 }
 0x210   : > { %800 = vmatpush.bf16.xpose.msrb.mxu1 %v791_v58 }
 0x216   : > { %v904_v60 = vpop.permute.xlu0 %903 }
 0x217   : > { %2124 = vmatmul.msk.bf16.vlgmr.msrb.gmra.mxu1 %vm786_vm4, %v2852_v48  ;;  %v909_v61 = vsel %vm786_vm4, %v904_v60, 0 }
 0x218   : > { %859 = vmatpush.bf16.xpose.msra.mxu1 %v850_v59  ;;  %918 = vmatpush.bf16.xpose.msrb.mxu3 %v909_v61 }
 0x21e   : > { %v960_v33 = vpop.permute.xlu0 %959 }
 0x227   : > { %2126 = vmatmul.msk.bf16.vlgmr.msra.gmra.mxu1 %vm786_vm4, %v843_v62 }
 0x294   : > { %v802_v0 = vpop.f32.mrf.mxu1 }
 0x295   : > { %v806_v1 = vmul.f32 0.25, %v802_v0 }
 0x297   : > { %v807_v2 = vadd.f32 %v806_v1, %v2880_v63 }
 0x299   : > { %v809_v3 = vsel %vm808_vm5, %v807_v2, -inf }
 0x29a   : > { %810 = vmax.xlane.f32.xlu1 %v809_v3 }
 0x29c   : > { %v804_v4 = vpop.f32.mrf.mxu1 }
 0x2a4   : > { %v861_v5 = vpop.f32.mrf.mxu1 }
 0x2a5   : > { %v865_v6 = vmul.f32 0.25, %v861_v5 }
 0x2a7   : > { %v866_v7 = vadd.f32 %v865_v6, %v2880_v63 }
 0x2a9   : > { %v867_v8 = vsel %vm808_vm5, %v866_v7, -inf }
 0x2aa   : > { %868 = vmax.xlane.f32.xlu2 %v867_v8 }
 0x2ac   : > { %v863_v9 = vpop.f32.mrf.mxu1 }
 0x30d   : > { %v811_v10 = vpop.xlane.xlu1 %810 }
 0x30e   : > { %v812_v11 = vsub.f32 %v807_v2, %v811_v10 }
 0x310   : > { %v813_v12 = vmul.f32 1.442695, %v812_v11 }
 0x312   : > { %2500 = vpow2.f32 %v813_v12 }
 0x318   : > { %v2501_v14 = vpop.eup %2500 }
 0x319   : > { %v815_v15 = vsel %vm808_vm5, %v2501_v14, 0.0 }
 0x31a   : > { %816 = vadd.xlane.f32.xlu1 %v815_v15  ;;  %v2391_v15 = vld [vmem:[%s3244_s6] sm:$0xff] }
 0x31d   : > { %v869_v16 = vpop.xlane.xlu2 %868 }
 0x31e   : > { %v870_v17 = vsub.f32 %v866_v7, %v869_v16 }
 0x320   : > { %v871_v18 = vmul.f32 1.442695, %v870_v17 }
 0x322   : > { %2502 = vpow2.f32 %v871_v18 }
 0x328   : > { %v2503_v19 = vpop.eup %2502 }
 0x329   : > { %v873_v20 = vsel %vm808_vm5, %v2503_v19, 0.0 }
 0x32a   : > { %874 = vadd.xlane.f32.xlu2 %v873_v20 }
 0x333   : > { %961 = vrot.lane.b32.xlu1 %v2852_v48, %s3269_s21 }
 0x342   : > { %880 = vrot.lane.b32.xlu2 %v2858_v53, %s2610_s22 }
 0x38d   : > { %v817_v21 = vpop.xlane.xlu1 %816 }
 0x38e   : > { %2504 = vrcp.f32 %v817_v21 }
 0x394   : > { %v2505_v22 = vpop.eup %2504 }
 0x395   : > { %v819_v23 = vmul.f32 %v2505_v22, %v2501_v14  ;;  %v2392_v14 = vld [vmem:[%s3244_s6 + $0x8] sm:$0xff] }
 0x397   : > { %v820_v24 = vpack.c.bf16 %v819_v23, %v819_v23  ;;  %v2485_v23 = vld [vmem:[%s3245_s7] ss:$0 sm:$0xff] }
 0x399   : > { %2125 = vmatmul.msk.bf16.vlgmr.msra.gmra.mxu3 %vm808_vm5, %v820_v24 }
 0x39d   : > { %v875_v25 = vpop.xlane.xlu2 %874 }
 0x39e   : > { %2506 = vrcp.f32 %v875_v25 }
 0x3a4   : > { %v2507_v26 = vpop.eup %2506 }
 0x3a5   : > { %v877_v27 = vmul.f32 %v2507_v26, %v2503_v19  ;;  %v962_v28 = vpop.permute.xlu1 %961  ;;  %v881_v29 = vpop.permute.xlu2 %880 }
 0x3a6   : > { %v967_v30 = vsel %vm786_vm4, %v962_v28, 0  ;;  %v886_v31 = vsel %vm825_vm3, %v881_v29, 0  ;;  %v2615_v29 = vmov 64.0  }
 0x3a7   : > { %895 = vmatpush.bf16.msrb.mxu2 %v886_v31  ;;  %976 = vmatpush.bf16.xpose.msrb.mxu1 %v967_v30  ;;  %v878_v32 = vpack.c.bf16 %v877_v27, %v877_v27 }
 0x3a9   : > { %2128 = vmatmul.msk.bf16.vlgmr.msrb.gmra.mxu3 %vm786_vm4, %v902_v13  ;;  %v2393_v13 = vld [vmem:[%s3244_s6 + $0x10] sm:$0xff] }
 0x3aa   : > { %2127 = vmatmul.msk.bf16.vlgmr.msrb.gmra.mxu2 %vm808_vm5, %v878_v32 }
 0x3ae   : > { %2130 = vmatmul.msk.bf16.vlgmr.msrb.gmra.mxu1 %vm786_vm4, %v960_v33 }
 0x41c   : > { %v2898_v34 = vpop.f32.mrf.mxu3 }
 0x424   : > { %v840_v35 = vpop.f32.mrf.mxu3 }
 0x42b   : > { %v978_v36 = vpop.f32.mrf.mxu1 }
 0x42c   : > { %v982_v37 = vmul.f32 0.25, %v978_v36  ;;  %v920_v38 = vpop.f32.mrf.mxu3 }
 0x42d   : > { %v924_v39 = vmul.f32 0.25, %v920_v38  ;;  %v897_v40 = vpop.f32.mrf.mxu2 }
 0x42e   : > { %1018 = vrot.lane.b32.xlu2 %v897_v40, %s3269_s21  ;;  %v983_v42 = vadd.f32 %v982_v37, %v2880_v63  ;;  %v2398_v40 = vld [vmem:[%s3248_s10 + $0x18] sm:$0xff] }
 0x42f   : > { %v925_v43 = vadd.f32 %v924_v39, %v2880_v63 }
 0x430   : > { %v984_v44 = vsel %vm808_vm5, %v983_v42, -inf }
 0x431   : > { %985 = vmax.xlane.f32.xlu0 %v984_v44  ;;  %v926_v45 = vsel %vm808_vm5, %v925_v43, -inf  ;;  %v2395_v44 = vld [vmem:[%s3248_s10] sm:$0xff] }
 0x432   : > { %927 = vmax.xlane.f32.xlu1 %v926_v45  ;;  %v2406_v45 = vld [vmem:[%s3250_s12 + $0x38] sm:$0xff] }
 0x433   : > { %v980_v46 = vpop.f32.mrf.mxu1  ;;  %1250 = vmatpush.bf16.msra.mxu1 %v2406_v45 }
 0x434   : > { %v922_v47 = vpop.f32.mrf.mxu3 }
 0x435   : > { %v899_v48 = vpop.f32.mrf.mxu2 }
 0x436   : > { %v2405_v48 = vld [vmem:[%s3250_s12 + $0x30] sm:$0xff] }
 0x437   : > { %1251 = vmatpush.bf16.msra.mxu1 %v2405_v48 }
 0x44b   : > { %996 = vrot.lane.b32.xlu1 %v2858_v53, %s3263_s20 }
 0x488   : > { %v1019_v16 = vpop.permute.xlu2 %1018 }
 0x489   : > { %v1029_v18 = vsel %vm786_vm4, %v2898_v34, %v1019_v16 }
 0x4a4   : > { %v986_v49 = vpop.xlane.xlu0 %985 }
 0x4a5   : > { %v987_v50 = vsub.f32 %v983_v42, %v986_v49  ;;  %v928_v51 = vpop.xlane.xlu1 %927  ;;  %v2397_v42 = vld [vmem:[%s3248_s10 + $0x10] sm:$0xff] }
 0x4a6   : > { %v929_v54 = vsub.f32 %v925_v43, %v928_v51  ;;  %v2396_v43 = vld [vmem:[%s3248_s10 + $0x8] sm:$0xff]  ;;  %v2403_v51 = vld [vmem:[%s3250_s12 + $0x20] sm:$0xff] }
 0x4a7   : > { %v988_v52 = vmul.f32 1.442695, %v987_v50  ;;  %v2404_v50 = vld [vmem:[%s3250_s12 + $0x28] sm:$0xff] }
 0x4a8   : > { %v930_v55 = vmul.f32 1.442695, %v929_v54  ;;  %1252 = vmatpush.bf16.msra.mxu1 %v2404_v50 }
 0x4a9   : > { %2508 = vpow2.f32 %v988_v52 }
 0x4aa   : > { %2510 = vpow2.f32 %v930_v55  ;;  %v2402_v55 = vld [vmem:[%s3250_s12 + $0x18] sm:$0xff] }
 0x4ac   : > { %1253 = vmatpush.bf16.msra.mxu1 %v2403_v51 }
 0x4af   : > { %v2509_v56 = vpop.eup %2508 }
 0x4b0   : > { %v990_v57 = vsel %vm808_vm5, %v2509_v56, 0.0  ;;  %v2511_v58 = vpop.eup %2510  ;;  %1254 = vmatpush.bf16.msra.mxu1 %v2402_v55 }
 0x4b1   : > { %991 = vadd.xlane.f32.xlu0 %v990_v57  ;;  %v932_v59 = vsel %vm808_vm5, %v2511_v58, 0.0 }
 0x4b9   : > { %933 = vadd.xlane.f32.xlu0 %v932_v59 }
 0x4bd   : > { %v997_v60 = vpop.permute.xlu1 %996 }
 0x4be   : > { %v1002_v61 = vsel %vm825_vm3, %v997_v60, 0 }
 0x4bf   : > { %1011 = vmatpush.bf16.msra.mxu2 %v1002_v61  ;;  %v2486_v61 = vld [vmem:[%s3246_s8] ss:$0 sm:$0xff] }
 0x4cd   : > { %938 = vrot.lane.b32.xlu0 %v2858_v53, %s3267_s23  ;;  %v2394_v53 = vld [vmem:[%s3244_s6 + $0x18] sm:$0xff] }
 0x4ce   : > { %1078 = vmatpush.bf16.msra.mxu3 %v2394_v53 }
 0x4d2   : > { %1079 = vmatpush.bf16.msra.mxu3 %v2393_v13 }
 0x4d6   : > { %1080 = vmatpush.bf16.msra.mxu3 %v2392_v14 }
 0x4da   : > { %1081 = vmatpush.bf16.msra.mxu3 %v2391_v15 }
 0x524   : > { %v992_v62 = vpop.xlane.xlu0 %991 }
 0x525   : > { %2512 = vrcp.f32 %v992_v62 }
 0x52b   : > { %v2513_v0 = vpop.eup %2512 }
 0x52c   : > { %v994_v1 = vmul.f32 %v2513_v0, %v2509_v56  ;;  %v934_v3 = vpop.xlane.xlu0 %933  ;;  %v2487_v0 = vld [vmem:[%s3247_s9] ss:$0 sm:$0xff] }
 0x52d   : > { %2514 = vrcp.f32 %v934_v3 }
 0x52e   : > { %v995_v2 = vpack.c.bf16 %v994_v1, %v994_v1  ;;  %2516 = vrcp.f32 %v2615_v29  ;;  %v2225_v29 = vld [vmem:[%s3242_s4 + $0x60] sm:$0xf] }
 0x530   : > { %2131 = vmatmul.msk.bf16.vlgmr.msra.gmra.mxu2 %vm808_vm5, %v995_v2 }
 0x533   : > { %v2515_v4 = vpop.eup %2514 }
 0x534   : > { %v936_v5 = vmul.f32 %v2515_v4, %v2511_v58  ;;  %v2517_v30 = vpop.eup %2516  ;;  %v2401_v58 = vld [vmem:[%s3250_s12 + $0x10] sm:$0xff] }
 0x535   : > { %v1094_v31 = vmul.f32 64.0, %v2517_v30  ;;  %vm1098_vm8 = vweird.f32 %v2517_v30  ;;  %1255 = vmatpush.bf16.msra.mxu1 %v2401_v58  ;;  %v2490_v58 = vld [vmem:[%s3252_s14] ss:$0 sm:$0xff] }
 0x536   : > { %v937_v8 = vpack.c.bf16 %v936_v5, %v936_v5  ;;  %v2400_v5 = vld [vmem:[%s3250_s12 + $0x8] sm:$0xff] }
 0x537   : > { %v1095_v32 = vsub.f32 1.0, %v1094_v31  ;;  %v2411_v31 = vld [vmem:[%s3242_s4 + $0x64] sm:$0xf] }
 0x539   : > { %v1096_v33 = vmul.f32 %v2517_v30, %v1095_v32  ;;  %1256 = vmatpush.bf16.msra.mxu1 %v2400_v5 }
 0x53b   : > { %v1097_v34 = vadd.f32 %v2517_v30, %v1096_v33  ;;  %v2227_v33 = vld [vmem:[%s3242_s4 + $0x68] sm:$0xf0] }
 0x53d   : > { %v2939_v35 = vsel %vm1098_vm8, %v2517_v30, %v1097_v34  ;;  %v2412_v30 = vld [vmem:[%s3242_s4 + $0x64] sm:$0xf0]  ;;  %v2230_v34 = vor.u32 %v2411_v31, %v2227_v33 }
 0x53e   : > { %v2226_v32 = vor.u32 %v2412_v30, %v2225_v29 }
 0x53f   : > { %v939_v6 = vpop.permute.xlu0 %938 }
 0x540   : > { %v944_v7 = vsel %vm825_vm3, %v939_v6, 0  ;;  %v2399_v6 = vld [vmem:[%s3250_s12] sm:$0xff] }
 0x541   : > { %953 = vmatpush.bf16.msrb.mxu0 %v944_v7  ;;  %1257 = vmatpush.bf16.msra.mxu1 %v2399_v6  ;;  %v2488_v7 = vld [vmem:[%s3249_s11] ss:$0 sm:$0xff] }
 0x544   : > { %2129 = vmatmul.msk.bf16.vlgmr.msrb.gmra.mxu0 %vm808_vm5, %v937_v8 }
 0x545   : > { %1171 = vmatpush.bf16.msra.mxu0 %v2398_v40 }
 0x549   : > { %1172 = vmatpush.bf16.msra.mxu0 %v2397_v42  ;;  %v2209_v42 = vld [vmem:[%s3242_s4 + $0x40] sm:$0xf] }
 0x54d   : > { %1173 = vmatpush.bf16.msra.mxu0 %v2396_v43  ;;  %v2408_v43 = vld [vmem:[%s3242_s4 + $0x44] sm:$0xf0] }
 0x54e   : > { %v2210_v45 = vor.u32 %v2408_v43, %v2209_v42 }
 0x551   : > { %1174 = vmatpush.bf16.msra.mxu0 %v2395_v44  ;;  %v2407_v44 = vld [vmem:[%s3242_s4 + $0x44] sm:$0xf] }
 0x5b3   : > { %v1013_v9 = vpop.f32.mrf.mxu2 }
 0x5b4   : > { %1026 = vrot.lane.b32.xlu1 %v1013_v9, %s2608_s29 }
 0x5bb   : > { %v1015_v10 = vpop.f32.mrf.mxu2 }
 0x5c1   : > { %v955_v11 = vpop.f32.mrf.mxu0 }
 0x5c2   : > { %1022 = vrot.lane.b32.xlu2 %v955_v11, %s3265_s27  ;;  %s3292_s27 = smov 80  }
 0x5c9   : > { %v957_v12 = vpop.f32.mrf.mxu0 }
 0x5ca   : > { %v2489_v12 = vld [vmem:[%s3251_s13] ss:$0 sm:$0xff] }
 0x61c   : > { %v1023_v17 = vpop.permute.xlu2 %1022 }
 0x61d   : > { %v1031_v19 = vsel %vm1030_vm6, %v1029_v18, %v1023_v17 }
 0x626   : > { %v1027_v20 = vpop.permute.xlu1 %1026 }
 0x627   : > { %v1033_v21 = vsel %vm1032_vm7, %v1031_v19, %v1027_v20 }
 0x628   : > { %v1042_v22 = vpack.c.bf16 %v1033_v21, %v1033_v21 }
 0x62a   : > { %2148 = vmatmul.msk.bf16.vlgmr.msra.gmra.mxu3 %vm752_vm2, %v1042_v22 }
 0x6ad   : > { %v1083_v24 = vpop.f32.mrf.mxu3 }
 0x6ae   : > { %v1084_v25 = vadd.f32 %v2485_v23, %v1083_v24  ;;  %v2233_v23 = vld [vmem:[%s3242_s4 + $0x70] sm:$0xf]  ;;  %v2414_v24 = vld [vmem:[%s3242_s4 + $0x74] sm:$0xf0] }
 0x6b0   : > { %v1087_v26 = vadd.f32 %v1084_v25, %v2843_v41  ;;  %v2413_v25 = vld [vmem:[%s3242_s4 + $0x74] sm:$0xf] }
 0x6b2   : > { %v1090_v27 = vsel %vm752_vm2, %v1087_v26, 0.0 }
 0x6b3   : > { %1091 = vadd.xlane.f32.xlu0 %v1090_v27  ;;  %v2235_v27 = vld [vmem:[%s3242_s4 + $0x78] sm:$0xf0] }
 0x6b5   : > { %v1085_v28 = vpop.f32.mrf.mxu3 }
 0x6b6   : > { %v2238_v28 = vor.u32 %v2413_v25, %v2235_v27 }
 0x6b8   : > { %1373 = vmatpush.bf16.msrb.mxu3 %v2238_v28 }
 0x6bc   : > { %1374 = vmatpush.bf16.msrb.mxu3 %v2230_v34 }
 0x726   : > { %v1092_v36 = vpop.xlane.xlu0 %1091 }
 0x727   : > { %v1100_v37 = vmul.f32 %v2939_v35, %v1092_v36  ;;  %v2217_v36 = vld [vmem:[%s3242_s4 + $0x50] sm:$0xf] }
 0x729   : > { %v1101_v38 = vsub.f32 %v1087_v26, %v1100_v37  ;;  %v2234_v26 = vor.u32 %v2414_v24, %v2233_v23  ;;  %v2410_v37 = vld [vmem:[%s3242_s4 + $0x54] sm:$0xf0] }
 0x72b   : > { %v1102_v39 = vmul.f32 %v1101_v38, %v1101_v38  ;;  %1360 = vmatpush.bf16.msrb.mxu2 %v2234_v26 }
 0x72d   : > { %v1103_v41 = vsel %vm752_vm2, %v1102_v39, 0.0  ;;  %v2218_v39 = vor.u32 %v2410_v37, %v2217_v36 }
 0x72e   : > { %1104 = vadd.xlane.f32.xlu2 %v1103_v41  ;;  %v2219_v41 = vld [vmem:[%s3242_s4 + $0x58] sm:$0xf0] }
 0x72f   : > { %1361 = vmatpush.bf16.msrb.mxu2 %v2226_v32 }
 0x733   : > { %1362 = vmatpush.bf16.msrb.mxu2 %v2218_v39 }
 0x737   : > { %1363 = vmatpush.bf16.msrb.mxu2 %v2210_v45 }
 0x7a1   : > { %v1105_v46 = vpop.xlane.xlu2 %1104 }
 0x7a2   : > { %v1106_v47 = vmul.f32 %v1105_v46, %v2939_v35  ;;  %v2211_v46 = vld [vmem:[%s3242_s4 + $0x48] sm:$0xf0] }
 0x7a4   : > { %v1107_v49 = vadd.f32 1e-05, %v1106_v47  ;;  %v2214_v47 = vor.u32 %v2407_v44, %v2211_v46 }
 0x7a6   : > { %2518 = vrsqrt.f32 %v1107_v49  ;;  %vm1114_vm10 = vweird.f32 %v1107_v49 }
 0x7ac   : > { %v2519_v52 = vpop.eup %2518 }
 0x7ad   : > { %v1109_v54 = vmul.f32 %v2519_v52, %v1107_v49  ;;  %vm1115_vm9 = vweird.f32 %v2519_v52 }
 0x7ae   : > { %vm1116_vm11 = vmor %vm1114_vm10, %vm1115_vm9 }
 0x7af   : > { %v1110_v56 = vmul.f32 %v2519_v52, %v1109_v54 }
 0x7b1   : > { %v1111_v57 = vmul.f32 0.5, %v1110_v56 }
 0x7b3   : > { %v1112_v59 = vsub.f32 1.5, %v1111_v57 }
 0x7b5   : > { %v1113_v60 = vmul.f32 %v2519_v52, %v1112_v59 }
 0x7b7   : > { %v1117_v62 = vsel %vm1116_vm11, %v2519_v52, %v1113_v60  ;;  %v2491_v60 = vld [vmem:[%s3253_s15] ss:$0 sm:$0xff] }
 0x7b8   : > { %v1118_v1 = vmul.f32 %v1117_v62, %v1101_v38  ;;  %v2409_v38 = vld [vmem:[%s3242_s4 + $0x54] sm:$0xf] }
 0x7b9   : > { %v2222_v40 = vor.u32 %v2409_v38, %v2219_v41 }
 0x7ba   : > { %v1122_v2 = vmul.f32 %v2486_v61, %v1118_v1 }
 0x7bb   : > { %1375 = vmatpush.bf16.msrb.mxu3 %v2222_v40 }
 0x7bc   : > { %v1126_v3 = vadd.f32 %v2487_v0, %v1122_v2  ;;  %v2206_v2 = vld [vmem:[%s3243_s5 + $0x2] sm:$0x3] }
 0x7be   : > { %v1135_v4 = vpack.c.bf16 %v1126_v3, %v1126_v3 }
 0x7bf   : > { %1376 = vmatpush.bf16.msrb.mxu3 %v2214_v47 }
 0x7c0   : > { %2165 = vmatmul.msk.bf16.vlgmr.msra.gmra.mxu0 %vm752_vm2, %v1135_v4  ;;  %v1310_v4 = vperm.slane %v2206_v2, 1 }
 0x83d   : > { %v1176_v8 = vpop.f32.mrf.mxu0 }
 0x83e   : > { %v1177_v53 = vadd.f32 %v2488_v7, %v1176_v8 }
 0x840   : > { %v1180_v9 = vmax.f32 %v1177_v53, 0.0 }
 0x842   : > { %v1197_v10 = vpack.c.bf16 %v1180_v9, %v1180_v9 }
 0x844   : > { %1258 = vmatmul.bf16.vlgmr.msra.gmra.mxu1 %v1197_v10 }
 0x845   : > { %v1178_v11 = vpop.f32.mrf.mxu0 }
 0x8c1   : > { %v1259_v13 = vpop.f32.mrf.mxu1 }
 0x8c2   : > { %v1260_v14 = vadd.f32 %v2489_v12, %v1259_v13 }
 0x8c4   : > { %v1263_v15 = vadd.f32 %v1260_v14, %v1126_v3  ;;  %v1309_v3 = vperm.slane %v2206_v2, 0 }
 0x8c6   : > { %v1266_v16 = vsel %vm752_vm2, %v1263_v15, 0.0 }
 0x8c7   : > { %1267 = vadd.xlane.f32.xlu1 %v1266_v16 }
 0x8c9   : > { %v1261_v17 = vpop.f32.mrf.mxu1 }
 0x93a   : > { %v1268_v18 = vpop.xlane.xlu1 %1267 }
 0x93b   : > { %v1269_v19 = vmul.f32 %v1268_v18, %v2939_v35 }
 0x93d   : > { %v1270_v20 = vsub.f32 %v1263_v15, %v1269_v19 }
 0x93f   : > { %v1271_v21 = vmul.f32 %v1270_v20, %v1270_v20 }
 0x941   : > { %v1272_v22 = vsel %vm752_vm2, %v1271_v21, 0.0 }
 0x942   : > { %1273 = vadd.xlane.f32.xlu0 %v1272_v22 }
 0x9b5   : > { %v1274_v48 = vpop.xlane.xlu0 %1273 }
 0x9b6   : > { %v1275_v49 = vmul.f32 %v1274_v48, %v2939_v35 }
 0x9b8   : > { %v1276_v50 = vadd.f32 1e-05, %v1275_v49 }
 0x9ba   : > { %2520 = vrsqrt.f32 %v1276_v50  ;;  %vm1283_vm13 = vweird.f32 %v1276_v50 }
 0x9c0   : > { %v2521_v51 = vpop.eup %2520 }
 0x9c1   : > { %v1278_v52 = vmul.f32 %v2521_v51, %v1276_v50  ;;  %vm1284_vm12 = vweird.f32 %v2521_v51 }
 0x9c2   : > { %vm1285_vm14 = vmor %vm1283_vm13, %vm1284_vm12 }
 0x9c3   : > { %v1279_v54 = vmul.f32 %v2521_v51, %v1278_v52 }
 0x9c5   : > { %v1280_v55 = vmul.f32 0.5, %v1279_v54 }
 0x9c7   : > { %v1281_v56 = vsub.f32 1.5, %v1280_v55 }
 0x9c9   : > { %v1282_v57 = vmul.f32 %v2521_v51, %v1281_v56 }
 0x9cb   : > { %v1286_v59 = vsel %vm1285_vm14, %v2521_v51, %v1282_v57 }
 0x9cc   : > { %v1287_v61 = vmul.f32 %v1286_v59, %v1270_v20 }
 0x9ce   : > { %v1291_v62 = vmul.f32 %v2490_v58, %v1287_v61 }
 0x9d0   : > { %v3051_v0 = vadd.f32 %v2491_v60, %v1291_v62 }
 0x9d2   : > { %v1305_v1 = vpack.c.bf16 %v3051_v0, %v3051_v0 }
 0x9d4   : > { %2239 = vmatmul.msk.bf16.vlgmr.msrb.gmra.mxu2 %vm752_vm2, %v1305_v1  ;;  %2240 = vmatmul.msk.bf16.vlgmr.msrb.gmra.mxu3 %vm752_vm2, %v1305_v1 }
 0xa57   : > { %v1365_v5 = vpop.f32.mrf.mxu2  ;;  %v1378_v6 = vpop.f32.mrf.mxu3 }
 0xa58   : > { %v1366_v7 = vadd.f32 %v1365_v5, %v1309_v3  ;;  %v1379_v8 = vadd.f32 %v1378_v6, %v1310_v4 }
 0xa5a   : > { %v1382_v53 = vpack.c.bf16 %v1366_v7, %v1366_v7  ;;  %v3060_v9 = vpack.c.bf16 %v1379_v8, %v1379_v8 }
 0xa5c   : > { %1439 = vrot.lane.b32.xlu0 %v1382_v53, %s2610_s22  ;;  %1441 = vrot.lane.b32.xlu1 %v1382_v53, %s2608_s29  ;;  %v1424_v10 = vsel %vm825_vm3, %v3060_v9, 0 }
 0xa5d   : > { %1384 = vrot.lane.b32.xlu2 %v1382_v53, %s3288_s25  ;;  %1433 = vmatpush.bf16.msra.mxu2 %v1424_v10  ;;  %s590_s25 = sand.u32 1, %s2596_s28  }
 0xa5e   : > { %s1949_s24 = scalar_lea.sflag [#allocation3], %s590_s25 }
 0xa5f   : > { %v1367_v11 = vpop.f32.mrf.mxu2  ;;  %v1380_v12 = vpop.f32.mrf.mxu3 }
 0xa64   : > { %1558 = vrot.lane.b32.xlu0 %v1382_v53, %s3289_s26  ;;  %1498 = vrot.lane.b32.xlu1 %v1382_v53, %s3290_s19 }
 0xa65   : > { %1500 = vrot.lane.b32.xlu2 %v1382_v53, %s3291_s30 }
 0xa6d   : > { %1556 = vrot.lane.b32.xlu2 %v1382_v53, %s3292_s27 }
 0xab7   : > { %v1385_v13 = vpop.permute.xlu2 %1384 }
 0xab8   : > { %v1390_v14 = vsel %vm786_vm4, %v1385_v13, 0 }
 0xab9   : > { %1399 = vmatpush.bf16.xpose.msrb.mxu0 %v1390_v14 }
 0xabf   : > { %v1501_v15 = vpop.permute.xlu2 %1500 }
 0xac0   : > { %v1506_v16 = vsel %vm786_vm4, %v1501_v15, 0  ;;  %2241 = vmatmul.msk.bf16.vlgmr.msrb.gmra.mxu0 %vm786_vm4, %v1382_v53 }
 0xac1   : > { %1515 = vmatpush.bf16.xpose.msrb.mxu1 %v1506_v16 }
 0xac7   : > { %v1557_v23 = vpop.permute.xlu2 %1556 }
 0xace   : > { %v1440_v17 = vpop.permute.xlu0 %1439  ;;  %v1442_v18 = vpop.permute.xlu1 %1441 }
 0xacf   : > { %v1447_v19 = vsel %vm786_vm4, %v1442_v18, 0 }
 0xad0   : > { %1456 = vmatpush.bf16.xpose.msra.mxu3 %v1447_v19 }
 0xad6   : > { %v1559_v20 = vpop.permute.xlu0 %1558  ;;  %v1499_v21 = vpop.permute.xlu1 %1498 }
 0xad7   : > { %v1564_v22 = vsel %vm786_vm4, %v1559_v20, 0  ;;  %2243 = vmatmul.msk.bf16.vlgmr.msra.gmra.mxu3 %vm786_vm4, %v1440_v17  ;;  %2245 = vmatmul.msk.bf16.vlgmr.msrb.gmra.mxu1 %vm786_vm4, %v1499_v21 }
 0xad8   : > { %1573 = vmatpush.bf16.xpose.msrb.mxu3 %v1564_v22 }
 0xae7   : > { %2247 = vmatmul.msk.bf16.vlgmr.msrb.gmra.mxu3 %vm786_vm4, %v1557_v23 }
 0xb3d   : > { %v1401_v24 = vpop.f32.mrf.mxu0 }
 0xb3e   : > { %v1405_v25 = vmul.f32 0.25, %v1401_v24 }
 0xb40   : > { %v1406_v26 = vadd.f32 %v1405_v25, %v2880_v63 }
 0xb42   : > { %v1407_v27 = vsel %vm808_vm5, %v1406_v26, -inf }
 0xb43   : > { %1408 = vmax.xlane.f32.xlu0 %v1407_v27 }
 0xb45   : > { %v1403_v28 = vpop.f32.mrf.mxu0 }
 0xb54   : > { %v1517_v29 = vpop.f32.mrf.mxu1 }
 0xb55   : > { %v1521_v30 = vmul.f32 0.25, %v1517_v29 }
 0xb57   : > { %v1522_v31 = vadd.f32 %v1521_v30, %v2880_v63 }
 0xb59   : > { %v1523_v32 = vsel %vm808_vm5, %v1522_v31, -inf }
 0xb5a   : > { %v1458_v33 = vpop.f32.mrf.mxu3  ;;  %1524 = vmax.xlane.f32.xlu2 %v1523_v32  ;;  %v2418_v32 = vld [vmem:[%s3244_s6 + $0x38] sm:$0xff] }
 0xb5b   : > { %v1462_v34 = vmul.f32 0.25, %v1458_v33  ;;  %1675 = vmatpush.bf16.msra.mxu1 %v2418_v32  ;;  %v2417_v33 = vld [vmem:[%s3244_s6 + $0x30] sm:$0xff] }
 0xb5c   : > { %v1519_v36 = vpop.f32.mrf.mxu1 }
 0xb5d   : > { %v1463_v37 = vadd.f32 %v1462_v34, %v2880_v63  ;;  %v2416_v34 = vld [vmem:[%s3244_s6 + $0x28] sm:$0xff]  ;;  %v2415_v36 = vld [vmem:[%s3244_s6 + $0x20] sm:$0xff] }
 0xb5f   : > { %v1464_v38 = vsel %vm808_vm5, %v1463_v37, -inf  ;;  %1676 = vmatpush.bf16.msra.mxu1 %v2417_v33 }
 0xb60   : > { %1465 = vmax.xlane.f32.xlu1 %v1464_v38 }
 0xb62   : > { %v1460_v39 = vpop.f32.mrf.mxu3 }
 0xb63   : > { %1677 = vmatpush.bf16.msra.mxu1 %v2416_v34 }
 0xb67   : > { %1678 = vmatpush.bf16.msra.mxu1 %v2415_v36 }
 0xb6a   : > { %v1575_v41 = vpop.f32.mrf.mxu3 }
 0xb6b   : > { %v1579_v40 = vmul.f32 0.25, %v1575_v41 }
 0xb6d   : > { %v1580_v42 = vadd.f32 %v1579_v40, %v2880_v63 }
 0xb6f   : > { %v1581_v43 = vsel %vm808_vm5, %v1580_v42, -inf }
 0xb70   : > { %1582 = vmax.xlane.f32.xlu0 %v1581_v43 }
 0xb72   : > { %v1577_v44 = vpop.f32.mrf.mxu3 }
 0xb73   : > { %v2492_v44 = vld [vmem:[%s3245_s7 + $0x1] ss:$0 sm:$0xff] }
 0xb84   : > { %1477 = vrot.lane.b32.xlu0 %v3060_v9, %s2610_s22 }
 0xbb6   : > { %v1409_v45 = vpop.xlane.xlu0 %1408 }
 0xbb7   : > { %v1410_v46 = vsub.f32 %v1406_v26, %v1409_v45 }
 0xbb9   : > { %v1411_v47 = vmul.f32 1.442695, %v1410_v46 }
 0xbbb   : > { %2522 = vpow2.f32 %v1411_v47 }
 0xbc1   : > { %v2523_v48 = vpop.eup %2522 }
 0xbc2   : > { %v1413_v49 = vsel %vm808_vm5, %v2523_v48, 0.0 }
 0xbc3   : > { %1414 = vadd.xlane.f32.xlu1 %v1413_v49 }
 0xbcd   : > { %v1525_v50 = vpop.xlane.xlu2 %1524 }
 0xbce   : > { %v1526_v51 = vsub.f32 %v1522_v31, %v1525_v50 }
 0xbd0   : > { %v1527_v52 = vmul.f32 1.442695, %v1526_v51 }
 0xbd2   : > { %2524 = vpow2.f32 %v1527_v52 }
 0xbd3   : > { %v1466_v63 = vpop.xlane.xlu1 %1465 }
 0xbd4   : > { %v1467_v54 = vsub.f32 %v1463_v37, %v1466_v63 }
 0xbd6   : > { %v1468_v55 = vmul.f32 1.442695, %v1467_v54 }
 0xbd8   : > { %v2525_v56 = vpop.eup %2524  ;;  %2526 = vpow2.f32 %v1468_v55  ;;  %v2422_v55 = vld [vmem:[%s3248_s10 + $0x38] sm:$0xff] }
 0xbd9   : > { %v1529_v57 = vsel %vm808_vm5, %v2525_v56, 0.0 }
 0xbda   : > { %1530 = vadd.xlane.f32.xlu1 %v1529_v57  ;;  %v2419_v57 = vld [vmem:[%s3248_s10 + $0x20] sm:$0xff] }
 0xbde   : > { %v2527_v58 = vpop.eup %2526 }
 0xbdf   : > { %v1470_v59 = vsel %vm808_vm5, %v2527_v58, 0.0 }
 0xbe0   : > { %1471 = vadd.xlane.f32.xlu2 %v1470_v59 }
 0xbe3   : > { %v1583_v60 = vpop.xlane.xlu0 %1582 }
 0xbe4   : > { %v1584_v61 = vsub.f32 %v1580_v42, %v1583_v60 }
 0xbe6   : > { %v1585_v62 = vmul.f32 1.442695, %v1584_v61  ;;  %v2429_v61 = vld [vmem:[%s3250_s12 + $0x70] sm:$0xff] }
 0xbe8   : > { %2528 = vpow2.f32 %v1585_v62 }
 0xbee   : > { %v2529_v1 = vpop.eup %2528 }
 0xbef   : > { %v1587_v2 = vsel %vm808_vm5, %v2529_v1, 0.0 }
 0xbf0   : > { %1588 = vadd.xlane.f32.xlu2 %v1587_v2  ;;  %v2427_v2 = vld [vmem:[%s3250_s12 + $0x60] sm:$0xff] }
 0xbf3   : > { %1535 = vrot.lane.b32.xlu1 %v3060_v9, %s3290_s19 }
 0xbf6   : > { %v1478_v3 = vpop.permute.xlu0 %1477 }
 0xbf7   : > { %v1483_v4 = vsel %vm825_vm3, %v1478_v3, 0 }
 0xbf8   : > { %1492 = vmatpush.bf16.msra.mxu0 %v1483_v4 }
 0xc08   : > { %1593 = vrot.lane.b32.xlu2 %v3060_v9, %s3292_s27 }
 0xc36   : > { %v1415_v5 = vpop.xlane.xlu1 %1414 }
 0xc37   : > { %2530 = vrcp.f32 %v1415_v5  ;;  %v2426_v5 = vld [vmem:[%s3250_s12 + $0x58] sm:$0xff] }
 0xc3d   : > { %v2531_v6 = vpop.eup %2530 }
 0xc3e   : > { %v1417_v7 = vmul.f32 %v2531_v6, %v2523_v48 }
 0xc40   : > { %v1418_v8 = vpack.c.bf16 %v1417_v7, %v1417_v7 }
 0xc42   : > { %2242 = vmatmul.msk.bf16.vlgmr.msra.gmra.mxu2 %vm808_vm5, %v1418_v8  ;;  %v2425_v8 = vld [vmem:[%s3250_s12 + $0x50] sm:$0xff] }
 0xc4d   : > { %v1531_v10 = vpop.xlane.xlu1 %1530 }
 0xc53   : > { %v1472_v53 = vpop.xlane.xlu2 %1471 }
 0xc54   : > { %2532 = vrcp.f32 %v1472_v53 }
 0xc55   : > { %2534 = vrcp.f32 %v1531_v10 }
 0xc5a   : > { %v2533_v11 = vpop.eup %2532 }
 0xc5b   : > { %v1474_v12 = vmul.f32 %v2533_v11, %v2527_v58  ;;  %v2535_v14 = vpop.eup %2534  ;;  %v2430_v58 = vld [vmem:[%s3250_s12 + $0x78] sm:$0xff]  ;;  %v2493_v11 = vld [vmem:[%s3246_s8 + $0x1] ss:$0 sm:$0xff] }
 0xc5c   : > { %v1533_v16 = vmul.f32 %v2535_v14, %v2525_v56  ;;  %v2420_v56 = vld [vmem:[%s3248_s10 + $0x28] sm:$0xff]  ;;  %1846 = vmatpush.bf16.msra.mxu3 %v2430_v58 }
 0xc5d   : > { %v1475_v13 = vpack.c.bf16 %v1474_v12, %v1474_v12 }
 0xc5e   : > { %v1534_v18 = vpack.c.bf16 %v1533_v16, %v1533_v16 }
 0xc5f   : > { %2244 = vmatmul.msk.bf16.vlgmr.msra.gmra.mxu0 %vm808_vm5, %v1475_v13  ;;  %v2494_v13 = vld [vmem:[%s3247_s9 + $0x1] ss:$0 sm:$0xff] }
 0xc60   : > { %1847 = vmatpush.bf16.msra.mxu3 %v2429_v61 }
 0xc63   : > { %v1589_v15 = vpop.xlane.xlu2 %1588 }
 0xc64   : > { %2536 = vrcp.f32 %v1589_v15 }
 0xc65   : > { %v1536_v9 = vpop.permute.xlu1 %1535 }
 0xc66   : > { %v1541_v17 = vsel %vm825_vm3, %v1536_v9, 0 }
 0xc67   : > { %1550 = vmatpush.bf16.msrb.mxu2 %v1541_v17  ;;  %v2424_v17 = vld [vmem:[%s3250_s12 + $0x48] sm:$0xff] }
 0xc6a   : > { %v2537_v19 = vpop.eup %2536  ;;  %2246 = vmatmul.msk.bf16.vlgmr.msrb.gmra.mxu2 %vm808_vm5, %v1534_v18  ;;  %v2423_v18 = vld [vmem:[%s3250_s12 + $0x40] sm:$0xff] }
 0xc6b   : > { %v1591_v20 = vmul.f32 %v2537_v19, %v2529_v1  ;;  %v1594_v21 = vpop.permute.xlu2 %1593  ;;  %1765 = vmatpush.bf16.msra.mxu2 %v2422_v55  ;;  %v2428_v1 = vld [vmem:[%s3250_s12 + $0x68] sm:$0xff]  ;;  %v2495_v19 = vld [vmem:[%s3249_s11 + $0x1] ss:$0 sm:$0xff] }
 0xc6c   : > { %v1599_v22 = vsel %vm825_vm3, %v1594_v21, 0  ;;  %1848 = vmatpush.bf16.msra.mxu3 %v2428_v1 }
 0xc6d   : > { %v1592_v23 = vpack.c.bf16 %v1591_v20, %v1591_v20  ;;  %1608 = vmatpush.bf16.msrb.mxu0 %v1599_v22 }
 0xc70   : > { %2248 = vmatmul.msk.bf16.vlgmr.msrb.gmra.mxu0 %vm808_vm5, %v1592_v23  ;;  %1849 = vmatpush.bf16.msra.mxu3 %v2427_v2 }
 0xc74   : > { %1850 = vmatpush.bf16.msra.mxu3 %v2426_v5 }
 0xc78   : > { %1851 = vmatpush.bf16.msra.mxu3 %v2425_v8 }
 0xc7c   : > { %1852 = vmatpush.bf16.msra.mxu3 %v2424_v17 }
 0xc80   : > { %1853 = vmatpush.bf16.msra.mxu3 %v2423_v18 }
 0xcc5   : > { %v1435_v24 = vpop.f32.mrf.mxu2 }
 0xccd   : > { %v1437_v25 = vpop.f32.mrf.mxu2 }
 0xcce   : > { %v2496_v25 = vld [vmem:[%s3251_s13 + $0x1] ss:$0 sm:$0xff] }
 0xcdc   : > { %v1494_v26 = vpop.f32.mrf.mxu0 }
 0xcdd   : > { %1615 = vrot.lane.b32.xlu0 %v1494_v26, %s3289_s26  ;;  %s2372_s26 = sshll.u32 %s2732_s0, 3 }
 0xcde   : > { %s1959_s27 = scalar_lea.hbm %s3256_s18, %s2372_s26 }
 0xcdf   : > { %s1963_s20 = sshll.u32 %s1959_s27, 4  ;;  %s1964_s20 = int_to_ptr.hbm [resolvable:$true] %s1963_s20 }
 0xce0   : > { %s2556_s0 = sshra.s32 %s1964_s20, 4  ;;  %s2557_s0 = int_to_ptr.hbm [resolvable:$true] %s2556_s0 }
 0xce1   : > { %s2558_s3 = scalar_lea.hbm %s2557_s0, 8  ;;  %p2563_p0 = scmp.lt.s32.totalorder %s2557_s0, %s3256_s18 }
 0xce2   : > { %p2559_p11 = scmp.ne.s32.totalorder %s2557_s0, %s2558_s3 }
 0xce4   : > { %v1496_v27 = vpop.f32.mrf.mxu0  ;;  %p2560_p12 = pnand %p2559_p11, %p2749_p5 }
 0xce6   : > { %p2561_p13 = pneg %p2560_p12 }
 0xced   : > { %v1552_v28 = vpop.f32.mrf.mxu2  ;;  %v1610_v29 = vpop.f32.mrf.mxu0 }
 0xcee   : > { %1619 = vrot.lane.b32.xlu0 %v1552_v28, %s3291_s30  ;;  %s2562_s30 = scalar_lea.hbm %s3256_s18, 16 }
 0xcef   : > { %p2564_p1 = scmp.lt.s32.totalorder %s2562_s30, %s2558_s3 }
 0xcf1   : > { %p2565_p2 = por %p2564_p1, %p2563_p0 }
 0xcf3   : > { %p2566_p3 = pnand %p2565_p2, %p2561_p13 }
 0xcf5   : > { %v1554_v30 = vpop.f32.mrf.mxu2  ;;  %v1612_v31 = vpop.f32.mrf.mxu0 }
 0xcf6   : > { %1623 = vrot.lane.b32.xlu0 %v1610_v29, %s2608_s29  ;;  %s2051_s29 = sshll.u32 %s590_s25, 3 }
 0xcf7   : > { %s592_s1 = scalar_lea.vmem [#allocation2], %s2051_s29 }
 0xcf8   : > { %s1961_s21 = sshll.u32 %s592_s1, 4  ;;  %s1962_s21 = int_to_ptr.vmem [resolvable:$true] %s1961_s21 }
 0xd4f   : > { %v1616_v37 = vpop.permute.xlu0 %1615 }
 0xd50   : > { %v1626_v39 = vsel %vm786_vm4, %v1435_v24, %v1616_v37  ;;  %v2434_v37 = vld [vmem:[%s3254_s16 + $0x18] sm:$0xff] }
 0xd51   : > { %1938 = vmatpush.bf16.msra.mxu0 %v2434_v37 }
 0xd60   : > { %v1620_v38 = vpop.permute.xlu0 %1619 }
 0xd61   : > { %v1627_v41 = vsel %vm1030_vm6, %v1626_v39, %v1620_v38  ;;  %v2433_v38 = vld [vmem:[%s3254_s16 + $0x10] sm:$0xff]  ;;  %v2432_v39 = vld [vmem:[%s3254_s16 + $0x8] sm:$0xff] }
 0xd62   : > { %1939 = vmatpush.bf16.msra.mxu0 %v2433_v38 }
 0xd66   : > { %1940 = vmatpush.bf16.msra.mxu0 %v2432_v39 }
 0xd68   : > { %v1624_v40 = vpop.permute.xlu0 %1623 }
 0xd69   : > { %v1628_v42 = vsel %vm1032_vm7, %v1627_v41, %v1624_v40  ;;  %v2431_v41 = vld [vmem:[%s3254_s16] sm:$0xff] }
 0xd6a   : > { %v1638_v43 = vpack.c.bf16 %v1628_v42, %v1628_v42  ;;  %1941 = vmatpush.bf16.msra.mxu0 %v2431_v41 }
 0xd6c   : > { %2274 = vmatmul.msk.bf16.vlgmr.msra.gmra.mxu1 %vm752_vm2, %v1638_v43 }
 0xde9   : > { %v1680_v45 = vpop.f32.mrf.mxu1 }
 0xdea   : > { %v1681_v46 = vadd.f32 %v2492_v44, %v1680_v45 }
 0xdec   : > { %v1684_v47 = vadd.f32 %v1681_v46, %v3051_v0  ;;  %v2421_v0 = vld [vmem:[%s3248_s10 + $0x30] sm:$0xff] }
 0xded   : > { %1766 = vmatpush.bf16.msra.mxu2 %v2421_v0  ;;  %v2499_v0 = vld [vmem:[%s3255_s17] ss:$0 sm:$0xff] }
 0xdee   : > { %v1689_v48 = vsel %vm752_vm2, %v1684_v47, 0.0 }
 0xdef   : > { %1690 = vadd.xlane.f32.xlu1 %v1689_v48 }
 0xdf1   : > { %v1682_v49 = vpop.f32.mrf.mxu1  ;;  %1767 = vmatpush.bf16.msra.mxu2 %v2420_v56 }
 0xdf5   : > { %1768 = vmatpush.bf16.msra.mxu2 %v2419_v57 }
 0xe62   : > { %v1691_v50 = vpop.xlane.xlu1 %1690 }
 0xe63   : > { %v1692_v51 = vmul.f32 %v1691_v50, %v2939_v35  ;;  %v2497_v50 = vld [vmem:[%s3252_s14 + $0x1] ss:$0 sm:$0xff] }
 0xe65   : > { %v1693_v52 = vsub.f32 %v1684_v47, %v1692_v51 }
 0xe67   : > { %v1694_v63 = vmul.f32 %v1693_v52, %v1693_v52 }
 0xe69   : > { %v1695_v54 = vsel %vm752_vm2, %v1694_v63, 0.0 }
 0xe6a   : > { %1696 = vadd.xlane.f32.xlu2 %v1695_v54 }
 0xedd   : > { %v1697_v59 = vpop.xlane.xlu2 %1696 }
 0xede   : > { %v1698_v60 = vmul.f32 %v1697_v59, %v2939_v35 }
 0xee0   : > { %v1699_v62 = vadd.f32 1e-05, %v1698_v60 }
 0xee2   : > { %2538 = vrsqrt.f32 %v1699_v62  ;;  %vm1706_vm0 = vweird.f32 %v1699_v62 }
 0xee8   : > { %v2539_v3 = vpop.eup %2538 }
 0xee9   : > { %v1701_v4 = vmul.f32 %v2539_v3, %v1699_v62  ;;  %vm1707_vm15 = vweird.f32 %v2539_v3 }
 0xeea   : > { %vm1708_vm1 = vmor %vm1706_vm0, %vm1707_vm15 }
 0xeeb   : > { %v1702_v6 = vmul.f32 %v2539_v3, %v1701_v4 }
 0xeed   : > { %v1703_v7 = vmul.f32 0.5, %v1702_v6 }
 0xeef   : > { %v1704_v53 = vsub.f32 1.5, %v1703_v7 }
 0xef1   : > { %v1705_v10 = vmul.f32 %v2539_v3, %v1704_v53 }
 0xef3   : > { %v1709_v12 = vsel %vm1708_vm1, %v2539_v3, %v1705_v10 }
 0xef4   : > { %v1710_v14 = vmul.f32 %v1709_v12, %v1693_v52 }
 0xef6   : > { %v1714_v15 = vmul.f32 %v2493_v11, %v1710_v14 }
 0xef8   : > { %v1718_v16 = vadd.f32 %v2494_v13, %v1714_v15 }
 0xefa   : > { %v1728_v9 = vpack.c.bf16 %v1718_v16, %v1718_v16 }
 0xefc   : > { %2302 = vmatmul.msk.bf16.vlgmr.msra.gmra.mxu2 %vm752_vm2, %v1728_v9 }
 0xf7f   : > { %v1770_v20 = vpop.f32.mrf.mxu2 }
 0xf80   : > { %v1771_v21 = vadd.f32 %v2495_v19, %v1770_v20 }
 0xf82   : > { %v1774_v22 = vmax.f32 %v1771_v21, 0.0 }
 0xf84   : > { %v1792_v23 = vpack.c.bf16 %v1774_v22, %v1774_v22 }
 0xf86   : > { %1854 = vmatmul.bf16.vlgmr.msra.gmra.mxu3 %v1792_v23 }
 0xf87   : > { %v1772_v24 = vpop.f32.mrf.mxu2 }
0x1009   : > { %v1855_v26 = vpop.f32.mrf.mxu3 }
0x100a   : > { %v1856_v27 = vadd.f32 %v2496_v25, %v1855_v26 }
0x100c   : > { %v1859_v28 = vadd.f32 %v1856_v27, %v1718_v16 }
0x100e   : > { %v1864_v29 = vsel %vm752_vm2, %v1859_v28, 0.0 }
0x100f   : > { %1865 = vadd.xlane.f32.xlu0 %v1864_v29 }
0x1011   : > { %v1857_v30 = vpop.f32.mrf.mxu3 }
0x1082   : > { %v1866_v31 = vpop.xlane.xlu0 %1865 }
0x1083   : > { %v1867_v32 = vmul.f32 %v1866_v31, %v2939_v35 }
0x1085   : > { %v1868_v33 = vsub.f32 %v1859_v28, %v1867_v32 }
0x1087   : > { %v1869_v34 = vmul.f32 %v1868_v33, %v1868_v33 }
0x1089   : > { %v1870_v36 = vsel %vm752_vm2, %v1869_v34, 0.0 }
0x108a   : > { %1871 = vadd.xlane.f32.xlu1 %v1870_v36 }
0x10fd   : > { %v1872_v40 = vpop.xlane.xlu1 %1871 }
0x10fe   : > { %v1873_v42 = vmul.f32 %v1872_v40, %v2939_v35  ;;  %v2498_v35 = vld [vmem:[%s3253_s15 + $0x1] ss:$0 sm:$0xff] }
0x1100   : > { %v1874_v43 = vadd.f32 1e-05, %v1873_v42 }
0x1102   : > { %2540 = vrsqrt.f32 %v1874_v43  ;;  %vm1881_vm4 = vweird.f32 %v1874_v43 }
0x1108   : > { %v2541_v44 = vpop.eup %2540 }
0x1109   : > { %v1876_v45 = vmul.f32 %v2541_v44, %v1874_v43  ;;  %vm1882_vm3 = vweird.f32 %v2541_v44 }
0x110a   : > { %vm1883_vm5 = vmor %vm1881_vm4, %vm1882_vm3 }
0x110b   : > { %v1877_v46 = vmul.f32 %v2541_v44, %v1876_v45 }
0x110d   : > { %v1878_v47 = vmul.f32 0.5, %v1877_v46 }
0x110f   : > { %v1879_v48 = vsub.f32 1.5, %v1878_v47 }
0x1111   : > { %v1880_v49 = vmul.f32 %v2541_v44, %v1879_v48 }
0x1113   : > { %v1884_v51 = vsel %vm1883_vm5, %v2541_v44, %v1880_v49 }
0x1114   : > { %v1885_v52 = vmul.f32 %v1884_v51, %v1868_v33 }
0x1116   : > { %v1889_v63 = vmul.f32 %v2497_v50, %v1885_v52 }
0x1118   : > { %v1893_v54 = vadd.f32 %v2498_v35, %v1889_v63 }
0x111a   : > { %v1902_v55 = vpack.c.bf16 %v1893_v54, %v1893_v54 }
0x111c   : > { %2370 = vmatmul.msk.bf16.vlgmr.msra.gmra.mxu0 %vm752_vm2, %v1902_v55 }
0x1199   : > { %v1943_v56 = vpop.f32.mrf.mxu0 }
0x119a   : > { %v1944_v57 = vadd.f32 %v2499_v0, %v1943_v56 }
0x119c   : > { %1947 = vst [vmem:[%s592_s1] sm:$0xff] %v1944_v57 }
0x119d   : > { %2569 = shalt.err (!%p2566_p3)
}
0x119e   : > { %2435 = dma.vmem_to_hbm [thread:$0]  (%p2749_p5), %s1962_s21, 128, %s1964_s20, %s1949_s24  }
0x11a1   : > { %v1945_v58 = vpop.f32.mrf.mxu0 }
0x11a2 PF: > { %s3293_s25 = sld [smem:[#allocation7_spill]] }
0x11a3   : > { %s3294_s27 = sld [smem:[#allocation5_spill]] }
0x11a8   : > { %p2441_p4 = scmp.ge.s32.totalorder %s3293_s25, 2 }
0x11a9   : > { %s1975_s1 = sand.u32 1, %s3294_s27  }
0x11aa   : > { %p2438_p7 = pnand %p2441_p4, %p2753_p6  ;;  %s1976_s26 = scalar_lea.sflag [#allocation3], %s1975_s1 }
0x11ac   : > { %p2439_p8 = pneg %p2438_p7 }
0x11ae   : > { %2587 = dma.done.wait (%p2439_p8), %s1976_s26, 128  }
0x11af   : > { %2589 = vsyncadd (%p2439_p8), %s1976_s26, 4294967168  ;;  %s3296_s30 = sld [smem:[#allocation8_spill]]  ;;  %s3299_s27 = smov %s2596_s28 }
0x11b0   : > { %s3297_s3 = sld [smem:[#allocation6_spill]] }
0x11b1   : > { %s3298_s29 = sld [smem:[#allocation9_spill]] }
0x11b5   : > { %p28_p9 = scmp.ge.s32.totalorder %s3296_s30, 4  }
0x11b6   : > { %s3300_s28 = smov %s3297_s3 }
0x11b7   :  { %30 = sbr.rel (!%p28_p9) target bundleno = 8 (0x8), region = 145 }
0x11bc   :  { %1982 = vsyncpa [#allocation3], 1 }
0x11bd   :  { %1984 = vsyncpa [#allocation3 + $0x1], 1 }

</bundles_post_ra>
